<compile_context>
chip_gen: v7x
topology: tpu7x:2x2x1
jax: 0.10.0
libtpu: 0.0.40
codegen_flags: <defaults>
</compile_context>

<pallas_src>
import math

import jax
import jax.numpy as jnp
from jax.experimental import pallas as pl
from jax.experimental.pallas import tpu as pltpu

# ---------------- small ViT config (ViT-*/14 style, shrunk) ----------------
IMG = 28          # image side (real ViT-H/14 uses 224)
PATCH = 14        # patch size (matches ViT-H/14)
CIN = 3
HIDDEN = 32       # real: 1280
HEADS = 4         # real: 16
HEAD_DIM = HIDDEN // HEADS
MLP = 64          # real: 5120
LAYERS = 2        # real: 32
NUM_CLASSES = 102
HEAD_PAD = 128    # lane-dense classifier output; sliced back to NUM_CLASSES in wrapper
LN_EPS = 1e-6     # torchvision ViT uses LayerNorm(eps=1e-6)

N_PATCH_SIDE = IMG // PATCH
N_PATCHES = N_PATCH_SIDE * N_PATCH_SIDE
SEQ = N_PATCHES + 1
PATCH_K = CIN * PATCH * PATCH
ATTN_SCALE = 1.0 / math.sqrt(HEAD_DIM)


# ---------------- in-kernel helpers ----------------
def _layernorm(x, g, b):
    mu = jnp.mean(x, axis=-1, keepdims=True)
    var = jnp.mean(jnp.square(x - mu), axis=-1, keepdims=True)
    return (x - mu) * jax.lax.rsqrt(var + LN_EPS) * g + b


def _gelu(x):
    # exact (erf) GELU, matching torch nn.GELU() default
    return 0.5 * x * (1.0 + jax.lax.erf(x * (1.0 / math.sqrt(2.0))))


def _full_spec(shape):
    """Whole-array block, constant index map (weights stay resident in VMEM across grid)."""
    nd = len(shape)
    return pl.BlockSpec(shape, lambda b, _nd=nd: (0,) * _nd)


# ---------------- the single fused ViT forward kernel ----------------
def vit_kernel(xp_ref, wc_ref, add_ref,
               ln1_g, ln1_b, wqkv, bqkv, wo, ob,
               ln2_g, ln2_b, w1, b1, w2, b2,
               lnf_g, lnf_b, hw_ref, hb_ref,
               o_ref):
    D, H, DH = HIDDEN, HEADS, HEAD_DIM

    # ---- patch embedding (conv k=stride=PATCH == per-patch matmul) + cls token + pos ----
    # xp_ref: (1, SEQ, PATCH_K) with a zero row at s=0 (cls slot); add_ref row 0 = cls+pos[0],
    # rows s>=1 = conv_b + pos[s]; zero-row @ wc == 0 so row 0 becomes exactly cls+pos.
    h = jnp.dot(xp_ref[0], wc_ref[...], preferred_element_type=jnp.float32) + add_ref[0]

    # ---- encoder layers, statically unrolled (weights stacked on leading LAYERS axis) ----
    for l in range(LAYERS):
        # pre-LN multi-head self-attention
        y = _layernorm(h, ln1_g[l], ln1_b[l])
        qkv = jnp.dot(y, wqkv[l], preferred_element_type=jnp.float32) + bqkv[l]  # (SEQ, 3D)
        wo_l = wo[l]                                                             # (H, DH, D)
        attn = jnp.zeros((SEQ, D), jnp.float32)
        for hd in range(H):
            q = qkv[:, hd * DH:(hd + 1) * DH]
            k = qkv[:, D + hd * DH:D + (hd + 1) * DH]
            v = qkv[:, 2 * D + hd * DH:2 * D + (hd + 1) * DH]
            s = jnp.dot(q, k.T, preferred_element_type=jnp.float32) * ATTN_SCALE  # (SEQ, SEQ)
            m = jnp.max(s, axis=-1, keepdims=True)
            e = jnp.exp(s - m)
            p = e * pl.reciprocal(jnp.sum(e, axis=-1, keepdims=True), approx=True)
            ctx = jnp.dot(p, v, preferred_element_type=jnp.float32)               # (SEQ, DH)
            attn = attn + jnp.dot(ctx, wo_l[hd], preferred_element_type=jnp.float32)
        h = h + attn + ob[l]                                          # residual + out-proj bias

        # pre-LN MLP (exact GELU)
        z = _layernorm(h, ln2_g[l], ln2_b[l])
        z = jnp.dot(z, w1[l], preferred_element_type=jnp.float32) + b1[l]
        z = _gelu(z)
        z = jnp.dot(z, w2[l], preferred_element_type=jnp.float32) + b2[l]
        h = h + z

    # ---- final LN on class token + classification head (lane-dense, 128-wide) ----
    cls = _layernorm(h[0:1, :], lnf_g[...], lnf_b[...])
    o_ref[0] = jnp.dot(cls, hw_ref[...], preferred_element_type=jnp.float32) + hb_ref[...]


def vit_pallas(xp, w):
    B = xp.shape[0]
    ins = [xp, w["wc"], w["addterm"],
           w["ln1_g"], w["ln1_b"], w["wqkv"], w["bqkv"], w["wo"], w["ob"],
           w["ln2_g"], w["ln2_b"], w["w1"], w["b1"], w["w2"], w["b2"],
           w["lnf_g"], w["lnf_b"], w["head_w"], w["head_b"]]
    in_specs = [pl.BlockSpec((1, SEQ, PATCH_K), lambda b: (b, 0, 0))] + \
               [_full_spec(a.shape) for a in ins[1:]]
    return pl.pallas_call(
        vit_kernel,
        out_shape=jax.ShapeDtypeStruct((B, 1, HEAD_PAD), jnp.float32),
        grid=(B,),
        in_specs=in_specs,
        out_specs=pl.BlockSpec((1, 1, HEAD_PAD), lambda b: (b, 0, 0)),
        compiler_params=pltpu.CompilerParams(dimension_semantics=("parallel",)),
    )(*ins)


# ---------------- parameters (deterministic, synthetic; torch layouts) ----------------
def init_params(key):
    ks = jax.random.split(key, 4)

    def nrm(k, shape, scale=0.02):
        return (scale * jax.random.normal(k, shape)).astype(jnp.float32)

    params = {
        "conv_w": nrm(ks[0], (HIDDEN, CIN, PATCH, PATCH)),   # Conv2d(3, D, 14, stride=14)
        "conv_b": jnp.zeros((HIDDEN,), jnp.float32),
        "cls": nrm(ks[1], (1, 1, HIDDEN)),
        "pos": nrm(ks[2], (1, SEQ, HIDDEN)),
        "ln_f_g": jnp.ones((HIDDEN,), jnp.float32),
        "ln_f_b": jnp.zeros((HIDDEN,), jnp.float32),
        "head_w": nrm(ks[3], (NUM_CLASSES, HIDDEN)),
        "head_b": jnp.zeros((NUM_CLASSES,), jnp.float32),
        "layers": [],
    }
    for l in range(LAYERS):
        lk = jax.random.split(jax.random.fold_in(key, 100 + l), 4)
        params["layers"].append({
            "ln1_g": jnp.ones((HIDDEN,), jnp.float32),
            "ln1_b": jnp.zeros((HIDDEN,), jnp.float32),
            "qkv_w": nrm(lk[0], (3 * HIDDEN, HIDDEN)),        # nn.MultiheadAttention in_proj_weight
            "qkv_b": jnp.zeros((3 * HIDDEN,), jnp.float32),
            "proj_w": nrm(lk[1], (HIDDEN, HIDDEN)),           # out_proj
            "proj_b": jnp.zeros((HIDDEN,), jnp.float32),
            "ln2_g": jnp.ones((HIDDEN,), jnp.float32),
            "ln2_b": jnp.zeros((HIDDEN,), jnp.float32),
            "fc1_w": nrm(lk[2], (MLP, HIDDEN)),
            "fc1_b": jnp.zeros((MLP,), jnp.float32),
            "fc2_w": nrm(lk[3], (HIDDEN, MLP)),
            "fc2_b": jnp.zeros((HIDDEN,), jnp.float32),
        })
    return params


def prepare_params(p):
    """One-time (outside the forward) re-layout: pre-transpose weights, stack layers on a
    leading axis, split the out-proj per head, fold cls/pos/conv-bias into one additive
    term, and pad the classifier head to 128 lanes."""
    D, H, DH = HIDDEN, HEADS, HEAD_DIM
    out = {"wc": p["conv_w"].reshape(D, PATCH_K).T}                  # (PATCH_K, D)

    cls_row = p["cls"][0] + p["pos"][0, :1]                          # (1, D)
    tok_rows = p["pos"][0, 1:] + p["conv_b"][None, :]                # (N_PATCHES, D)
    out["addterm"] = jnp.concatenate([cls_row, tok_rows], axis=0)[None]   # (1, SEQ, D)

    out["lnf_g"] = p["ln_f_g"].reshape(1, D)
    out["lnf_b"] = p["ln_f_b"].reshape(1, D)
    pad = HEAD_PAD - NUM_CLASSES
    out["head_w"] = jnp.pad(p["head_w"].T, ((0, 0), (0, pad)))       # (D, HEAD_PAD)
    out["head_b"] = jnp.pad(p["head_b"], ((0, pad),)).reshape(1, HEAD_PAD)

    L = p["layers"]
    stack = lambda f: jnp.stack([f(lp) for lp in L], axis=0)
    out["ln1_g"] = stack(lambda lp: lp["ln1_g"].reshape(1, D))       # (L, 1, D)
    out["ln1_b"] = stack(lambda lp: lp["ln1_b"].reshape(1, D))
    out["wqkv"] = stack(lambda lp: lp["qkv_w"].T)                    # (L, D, 3D)
    out["bqkv"] = stack(lambda lp: lp["qkv_b"].reshape(1, 3 * D))    # (L, 1, 3D)
    out["wo"] = stack(lambda lp: lp["proj_w"].T.reshape(H, DH, D))   # (L, H, DH, D)
    out["ob"] = stack(lambda lp: lp["proj_b"].reshape(1, D))         # (L, 1, D)
    out["ln2_g"] = stack(lambda lp: lp["ln2_g"].reshape(1, D))
    out["ln2_b"] = stack(lambda lp: lp["ln2_b"].reshape(1, D))
    out["w1"] = stack(lambda lp: lp["fc1_w"].T)                      # (L, D, MLP)
    out["b1"] = stack(lambda lp: lp["fc1_b"].reshape(1, MLP))        # (L, 1, MLP)
    out["w2"] = stack(lambda lp: lp["fc2_w"].T)                      # (L, MLP, D)
    out["b2"] = stack(lambda lp: lp["fc2_b"].reshape(1, D))          # (L, 1, D)
    return out


# ---------------- forward pass (ViT semantics) ----------------
def vit_forward(params, x):
    B = x.shape[0]
    # patch extraction (pure layout plumbing in XLA); conv(kernel=stride=PATCH) == per-patch matmul
    xp = x.reshape(B, CIN, N_PATCH_SIDE, PATCH, N_PATCH_SIDE, PATCH)
    xp = xp.transpose(0, 2, 4, 1, 3, 5).reshape(B, N_PATCHES, PATCH_K)
    xp = jnp.pad(xp, ((0, 0), (1, 0), (0, 0)))                       # zero row at s=0 -> cls slot

    logits = vit_pallas(xp, params)                                  # (B, 1, HEAD_PAD)
    return logits[:, 0, :NUM_CLASSES]                                # (B, 102)


if __name__ == "__main__":
    key = jax.random.PRNGKey(0)
    kp, kx = jax.random.split(key)
    params = prepare_params(init_params(kp))
    x = jax.random.normal(kx, (2, CIN, IMG, IMG), dtype=jnp.float32)  # NCHW

    out = jax.jit(vit_forward)(params, x)
    out = jax.block_until_ready(out)
    assert out.shape == (2, NUM_CLASSES), out.shape
    assert out.dtype == jnp.float32
    print("KERNEL_OK")
</pallas_src>

<mosaic_0001>
module attributes {stable_mosaic.version = 11 : i64} {
  func.func @vit_kernel(%arg0: i32, %arg1: memref<1x5x588xf32, #tpu.memory_space<vmem>>, %arg2: memref<588x32xf32, #tpu.memory_space<vmem>>, %arg3: memref<1x5x32xf32, #tpu.memory_space<vmem>>, %arg4: memref<2x1x32xf32, #tpu.memory_space<vmem>>, %arg5: memref<2x1x32xf32, #tpu.memory_space<vmem>>, %arg6: memref<2x32x96xf32, #tpu.memory_space<vmem>>, %arg7: memref<2x1x96xf32, #tpu.memory_space<vmem>>, %arg8: memref<2x4x8x32xf32, #tpu.memory_space<vmem>>, %arg9: memref<2x1x32xf32, #tpu.memory_space<vmem>>, %arg10: memref<2x1x32xf32, #tpu.memory_space<vmem>>, %arg11: memref<2x1x32xf32, #tpu.memory_space<vmem>>, %arg12: memref<2x32x64xf32, #tpu.memory_space<vmem>>, %arg13: memref<2x1x64xf32, #tpu.memory_space<vmem>>, %arg14: memref<2x64x32xf32, #tpu.memory_space<vmem>>, %arg15: memref<2x1x32xf32, #tpu.memory_space<vmem>>, %arg16: memref<1x32xf32, #tpu.memory_space<vmem>>, %arg17: memref<1x32xf32, #tpu.memory_space<vmem>>, %arg18: memref<32x128xf32, #tpu.memory_space<vmem>>, %arg19: memref<1x128xf32, #tpu.memory_space<vmem>>, %arg20: memref<1x1x128xf32, #tpu.memory_space<vmem>>) attributes {dimension_semantics = [#tpu.dimension_semantics<parallel>], iteration_bounds = array<i64: 2>, scalar_prefetch = 0 : i64, scratch_operands = 0 : i64, tpu.core_type = #tpu.core_type<tc>, window_params = [{transform_indices = @transform_0, window_bounds = array<i64: 1, 5, 588>}, {pipeline_mode = #tpu.pipeline_mode<synchronous>, transform_indices = @transform_1, window_bounds = array<i64: 588, 32>}, {pipeline_mode = #tpu.pipeline_mode<synchronous>, transform_indices = @transform_2, window_bounds = array<i64: 1, 5, 32>}, {pipeline_mode = #tpu.pipeline_mode<synchronous>, transform_indices = @transform_3, window_bounds = array<i64: 2, 1, 32>}, {pipeline_mode = #tpu.pipeline_mode<synchronous>, transform_indices = @transform_4, window_bounds = array<i64: 2, 1, 32>}, {pipeline_mode = #tpu.pipeline_mode<synchronous>, transform_indices = @transform_5, window_bounds = array<i64: 2, 32, 96>}, {pipeline_mode = #tpu.pipeline_mode<synchronous>, transform_indices = @transform_6, window_bounds = array<i64: 2, 1, 96>}, {pipeline_mode = #tpu.pipeline_mode<synchronous>, transform_indices = @transform_7, window_bounds = array<i64: 2, 4, 8, 32>}, {pipeline_mode = #tpu.pipeline_mode<synchronous>, transform_indices = @transform_8, window_bounds = array<i64: 2, 1, 32>}, {pipeline_mode = #tpu.pipeline_mode<synchronous>, transform_indices = @transform_9, window_bounds = array<i64: 2, 1, 32>}, {pipeline_mode = #tpu.pipeline_mode<synchronous>, transform_indices = @transform_10, window_bounds = array<i64: 2, 1, 32>}, {pipeline_mode = #tpu.pipeline_mode<synchronous>, transform_indices = @transform_11, window_bounds = array<i64: 2, 32, 64>}, {pipeline_mode = #tpu.pipeline_mode<synchronous>, transform_indices = @transform_12, window_bounds = array<i64: 2, 1, 64>}, {pipeline_mode = #tpu.pipeline_mode<synchronous>, transform_indices = @transform_13, window_bounds = array<i64: 2, 64, 32>}, {pipeline_mode = #tpu.pipeline_mode<synchronous>, transform_indices = @transform_14, window_bounds = array<i64: 2, 1, 32>}, {pipeline_mode = #tpu.pipeline_mode<synchronous>, transform_indices = @transform_15, window_bounds = array<i64: 1, 32>}, {pipeline_mode = #tpu.pipeline_mode<synchronous>, transform_indices = @transform_16, window_bounds = array<i64: 1, 32>}, {pipeline_mode = #tpu.pipeline_mode<synchronous>, transform_indices = @transform_17, window_bounds = array<i64: 32, 128>}, {pipeline_mode = #tpu.pipeline_mode<synchronous>, transform_indices = @transform_18, window_bounds = array<i64: 1, 128>}, {transform_indices = @transform_19, window_bounds = array<i64: 1, 1, 128>}]} {
    %c0 = arith.constant 0 : index
    %c0_0 = arith.constant 0 : index
    %c0_1 = arith.constant 0 : index
    %0 = vector.load %arg1[%c0, %c0_0, %c0_1] : memref<1x5x588xf32, #tpu.memory_space<vmem>>, vector<1x5x588xf32>
    %1 = vector.shape_cast %0 : vector<1x5x588xf32> to vector<5x588xf32>
    %c0_2 = arith.constant 0 : index
    %c0_3 = arith.constant 0 : index
    %2 = vector.load %arg2[%c0_2, %c0_3] : memref<588x32xf32, #tpu.memory_space<vmem>>, vector<588x32xf32>
    %cst = arith.constant dense<0.000000e+00> : vector<5x32xf32>
    %3 = tpu.matmul %1, %2, %cst {dimension_numbers = #tpu.dot_dimension_numbers<[1], [0], [0], [1], [0, 0, 1, 1], [], []>} : vector<5x588xf32>, vector<588x32xf32>, vector<5x32xf32> -> vector<5x32xf32>
    %c0_4 = arith.constant 0 : index
    %c0_5 = arith.constant 0 : index
    %c0_6 = arith.constant 0 : index
    %4 = vector.load %arg3[%c0_4, %c0_5, %c0_6] : memref<1x5x32xf32, #tpu.memory_space<vmem>>, vector<1x5x32xf32>
    %5 = vector.shape_cast %4 : vector<1x5x32xf32> to vector<5x32xf32>
    %6 = arith.addf %3, %5 : vector<5x32xf32>
    %c0_7 = arith.constant 0 : index
    %c0_8 = arith.constant 0 : index
    %c0_9 = arith.constant 0 : index
    %7 = vector.load %arg4[%c0_7, %c0_8, %c0_9] : memref<2x1x32xf32, #tpu.memory_space<vmem>>, vector<1x1x32xf32>
    %8 = vector.shape_cast %7 : vector<1x1x32xf32> to vector<1x32xf32>
    %c0_10 = arith.constant 0 : index
    %c0_11 = arith.constant 0 : index
    %c0_12 = arith.constant 0 : index
    %9 = vector.load %arg5[%c0_10, %c0_11, %c0_12] : memref<2x1x32xf32, #tpu.memory_space<vmem>>, vector<1x1x32xf32>
    %10 = vector.shape_cast %9 : vector<1x1x32xf32> to vector<1x32xf32>
    %cst_13 = arith.constant dense<0.000000e+00> : vector<5xf32>
    %11 = vector.multi_reduction <add>, %6, %cst_13 [1] : vector<5x32xf32> to vector<5xf32>
    %12 = vector.shape_cast %11 : vector<5xf32> to vector<5x1xf32>
    %cst_14 = arith.constant 3.200000e+01 : f32
    %13 = vector.broadcast %cst_14 : f32 to vector<5x1xf32>
    %14 = arith.divf %12, %13 : vector<5x1xf32>
    %15 = vector.broadcast %14 : vector<5x1xf32> to vector<5x32xf32>
    %16 = arith.subf %6, %15 : vector<5x32xf32>
    %17 = arith.mulf %16, %16 : vector<5x32xf32>
    %cst_15 = arith.constant dense<0.000000e+00> : vector<5xf32>
    %18 = vector.multi_reduction <add>, %17, %cst_15 [1] : vector<5x32xf32> to vector<5xf32>
    %19 = vector.shape_cast %18 : vector<5xf32> to vector<5x1xf32>
    %cst_16 = arith.constant 3.200000e+01 : f32
    %20 = vector.broadcast %cst_16 : f32 to vector<5x1xf32>
    %21 = arith.divf %19, %20 : vector<5x1xf32>
    %22 = vector.broadcast %14 : vector<5x1xf32> to vector<5x32xf32>
    %23 = arith.subf %6, %22 : vector<5x32xf32>
    %cst_17 = arith.constant 9.99999997E-7 : f32
    %24 = vector.broadcast %cst_17 : f32 to vector<5x1xf32>
    %25 = arith.addf %21, %24 : vector<5x1xf32>
    %26 = math.rsqrt %25 : vector<5x1xf32>
    %27 = vector.broadcast %26 : vector<5x1xf32> to vector<5x32xf32>
    %28 = arith.mulf %23, %27 : vector<5x32xf32>
    %29 = vector.broadcast %8 : vector<1x32xf32> to vector<5x32xf32>
    %30 = arith.mulf %28, %29 : vector<5x32xf32>
    %31 = vector.broadcast %10 : vector<1x32xf32> to vector<5x32xf32>
    %32 = arith.addf %30, %31 : vector<5x32xf32>
    %c0_18 = arith.constant 0 : index
    %c0_19 = arith.constant 0 : index
    %c0_20 = arith.constant 0 : index
    %33 = vector.load %arg6[%c0_18, %c0_19, %c0_20] : memref<2x32x96xf32, #tpu.memory_space<vmem>>, vector<1x32x96xf32>
    %34 = vector.shape_cast %33 : vector<1x32x96xf32> to vector<32x96xf32>
    %cst_21 = arith.constant dense<0.000000e+00> : vector<5x96xf32>
    %35 = tpu.matmul %32, %34, %cst_21 {dimension_numbers = #tpu.dot_dimension_numbers<[1], [0], [0], [1], [0, 0, 1, 1], [], []>} : vector<5x32xf32>, vector<32x96xf32>, vector<5x96xf32> -> vector<5x96xf32>
    %c0_22 = arith.constant 0 : index
    %c0_23 = arith.constant 0 : index
    %c0_24 = arith.constant 0 : index
    %36 = vector.load %arg7[%c0_22, %c0_23, %c0_24] : memref<2x1x96xf32, #tpu.memory_space<vmem>>, vector<1x1x96xf32>
    %37 = vector.shape_cast %36 : vector<1x1x96xf32> to vector<1x96xf32>
    %38 = vector.broadcast %37 : vector<1x96xf32> to vector<5x96xf32>
    %39 = arith.addf %35, %38 : vector<5x96xf32>
    %c0_25 = arith.constant 0 : index
    %c0_26 = arith.constant 0 : index
    %c0_27 = arith.constant 0 : index
    %c0_28 = arith.constant 0 : index
    %40 = vector.load %arg8[%c0_25, %c0_26, %c0_27, %c0_28] : memref<2x4x8x32xf32, #tpu.memory_space<vmem>>, vector<1x4x8x32xf32>
    %41 = vector.shape_cast %40 : vector<1x4x8x32xf32> to vector<4x8x32xf32>
    %cst_29 = arith.constant 0.000000e+00 : f32
    %42 = vector.broadcast %cst_29 : f32 to vector<5x32xf32>
    %43 = vector.extract_strided_slice %39 {offsets = [0, 0], sizes = [5, 8], strides = [1, 1]} : vector<5x96xf32> to vector<5x8xf32>
    %44 = vector.extract_strided_slice %39 {offsets = [0, 32], sizes = [5, 8], strides = [1, 1]} : vector<5x96xf32> to vector<5x8xf32>
    %45 = vector.extract_strided_slice %39 {offsets = [0, 64], sizes = [5, 8], strides = [1, 1]} : vector<5x96xf32> to vector<5x8xf32>
    %46 = tpu.transpose %44, [1, 0] : vector<5x8xf32> -> vector<8x5xf32>
    %cst_30 = arith.constant dense<0.000000e+00> : vector<5x5xf32>
    %47 = tpu.matmul %43, %46, %cst_30 {dimension_numbers = #tpu.dot_dimension_numbers<[1], [0], [0], [1], [0, 0, 1, 1], [], []>} : vector<5x8xf32>, vector<8x5xf32>, vector<5x5xf32> -> vector<5x5xf32>
    %cst_31 = arith.constant 0.353553385 : f32
    %48 = vector.broadcast %cst_31 : f32 to vector<5x5xf32>
    %49 = arith.mulf %47, %48 : vector<5x5xf32>
    %cst_32 = arith.constant dense<0xFF800000> : vector<5xf32>
    %50 = vector.multi_reduction <maximumf>, %49, %cst_32 [1] : vector<5x5xf32> to vector<5xf32>
    %51 = vector.shape_cast %50 : vector<5xf32> to vector<5x1xf32>
    %52 = vector.broadcast %51 : vector<5x1xf32> to vector<5x5xf32>
    %53 = arith.subf %49, %52 : vector<5x5xf32>
    %54 = math.exp %53 : vector<5x5xf32>
    %cst_33 = arith.constant dense<0.000000e+00> : vector<5xf32>
    %55 = vector.multi_reduction <add>, %54, %cst_33 [1] : vector<5x5xf32> to vector<5xf32>
    %56 = vector.shape_cast %55 : vector<5xf32> to vector<5x1xf32>
    %57 = tpu.reciprocal %56 {approx = true} : vector<5x1xf32> -> vector<5x1xf32>
    %58 = vector.broadcast %57 : vector<5x1xf32> to vector<5x5xf32>
    %59 = arith.mulf %54, %58 : vector<5x5xf32>
    %cst_34 = arith.constant dense<0.000000e+00> : vector<5x8xf32>
    %60 = tpu.matmul %59, %45, %cst_34 {dimension_numbers = #tpu.dot_dimension_numbers<[1], [0], [0], [1], [0, 0, 1, 1], [], []>} : vector<5x5xf32>, vector<5x8xf32>, vector<5x8xf32> -> vector<5x8xf32>
    %61 = vector.extract_strided_slice %41 {offsets = [0, 0, 0], sizes = [1, 8, 32], strides = [1, 1, 1]} : vector<4x8x32xf32> to vector<1x8x32xf32>
    %62 = vector.shape_cast %61 : vector<1x8x32xf32> to vector<8x32xf32>
    %cst_35 = arith.constant dense<0.000000e+00> : vector<5x32xf32>
    %63 = tpu.matmul %60, %62, %cst_35 {dimension_numbers = #tpu.dot_dimension_numbers<[1], [0], [0], [1], [0, 0, 1, 1], [], []>} : vector<5x8xf32>, vector<8x32xf32>, vector<5x32xf32> -> vector<5x32xf32>
    %64 = arith.addf %42, %63 : vector<5x32xf32>
    %65 = vector.extract_strided_slice %39 {offsets = [0, 8], sizes = [5, 8], strides = [1, 1]} : vector<5x96xf32> to vector<5x8xf32>
    %66 = vector.extract_strided_slice %39 {offsets = [0, 40], sizes = [5, 8], strides = [1, 1]} : vector<5x96xf32> to vector<5x8xf32>
    %67 = vector.extract_strided_slice %39 {offsets = [0, 72], sizes = [5, 8], strides = [1, 1]} : vector<5x96xf32> to vector<5x8xf32>
    %68 = tpu.transpose %66, [1, 0] : vector<5x8xf32> -> vector<8x5xf32>
    %cst_36 = arith.constant dense<0.000000e+00> : vector<5x5xf32>
    %69 = tpu.matmul %65, %68, %cst_36 {dimension_numbers = #tpu.dot_dimension_numbers<[1], [0], [0], [1], [0, 0, 1, 1], [], []>} : vector<5x8xf32>, vector<8x5xf32>, vector<5x5xf32> -> vector<5x5xf32>
    %cst_37 = arith.constant 0.353553385 : f32
    %70 = vector.broadcast %cst_37 : f32 to vector<5x5xf32>
    %71 = arith.mulf %69, %70 : vector<5x5xf32>
    %cst_38 = arith.constant dense<0xFF800000> : vector<5xf32>
    %72 = vector.multi_reduction <maximumf>, %71, %cst_38 [1] : vector<5x5xf32> to vector<5xf32>
    %73 = vector.shape_cast %72 : vector<5xf32> to vector<5x1xf32>
    %74 = vector.broadcast %73 : vector<5x1xf32> to vector<5x5xf32>
    %75 = arith.subf %71, %74 : vector<5x5xf32>
    %76 = math.exp %75 : vector<5x5xf32>
    %cst_39 = arith.constant dense<0.000000e+00> : vector<5xf32>
    %77 = vector.multi_reduction <add>, %76, %cst_39 [1] : vector<5x5xf32> to vector<5xf32>
    %78 = vector.shape_cast %77 : vector<5xf32> to vector<5x1xf32>
    %79 = tpu.reciprocal %78 {approx = true} : vector<5x1xf32> -> vector<5x1xf32>
    %80 = vector.broadcast %79 : vector<5x1xf32> to vector<5x5xf32>
    %81 = arith.mulf %76, %80 : vector<5x5xf32>
    %cst_40 = arith.constant dense<0.000000e+00> : vector<5x8xf32>
    %82 = tpu.matmul %81, %67, %cst_40 {dimension_numbers = #tpu.dot_dimension_numbers<[1], [0], [0], [1], [0, 0, 1, 1], [], []>} : vector<5x5xf32>, vector<5x8xf32>, vector<5x8xf32> -> vector<5x8xf32>
    %83 = vector.extract_strided_slice %41 {offsets = [1, 0, 0], sizes = [1, 8, 32], strides = [1, 1, 1]} : vector<4x8x32xf32> to vector<1x8x32xf32>
    %84 = vector.shape_cast %83 : vector<1x8x32xf32> to vector<8x32xf32>
    %cst_41 = arith.constant dense<0.000000e+00> : vector<5x32xf32>
    %85 = tpu.matmul %82, %84, %cst_41 {dimension_numbers = #tpu.dot_dimension_numbers<[1], [0], [0], [1], [0, 0, 1, 1], [], []>} : vector<5x8xf32>, vector<8x32xf32>, vector<5x32xf32> -> vector<5x32xf32>
    %86 = arith.addf %64, %85 : vector<5x32xf32>
    %87 = vector.extract_strided_slice %39 {offsets = [0, 16], sizes = [5, 8], strides = [1, 1]} : vector<5x96xf32> to vector<5x8xf32>
    %88 = vector.extract_strided_slice %39 {offsets = [0, 48], sizes = [5, 8], strides = [1, 1]} : vector<5x96xf32> to vector<5x8xf32>
    %89 = vector.extract_strided_slice %39 {offsets = [0, 80], sizes = [5, 8], strides = [1, 1]} : vector<5x96xf32> to vector<5x8xf32>
    %90 = tpu.transpose %88, [1, 0] : vector<5x8xf32> -> vector<8x5xf32>
    %cst_42 = arith.constant dense<0.000000e+00> : vector<5x5xf32>
    %91 = tpu.matmul %87, %90, %cst_42 {dimension_numbers = #tpu.dot_dimension_numbers<[1], [0], [0], [1], [0, 0, 1, 1], [], []>} : vector<5x8xf32>, vector<8x5xf32>, vector<5x5xf32> -> vector<5x5xf32>
    %cst_43 = arith.constant 0.353553385 : f32
    %92 = vector.broadcast %cst_43 : f32 to vector<5x5xf32>
    %93 = arith.mulf %91, %92 : vector<5x5xf32>
    %cst_44 = arith.constant dense<0xFF800000> : vector<5xf32>
    %94 = vector.multi_reduction <maximumf>, %93, %cst_44 [1] : vector<5x5xf32> to vector<5xf32>
    %95 = vector.shape_cast %94 : vector<5xf32> to vector<5x1xf32>
    %96 = vector.broadcast %95 : vector<5x1xf32> to vector<5x5xf32>
    %97 = arith.subf %93, %96 : vector<5x5xf32>
    %98 = math.exp %97 : vector<5x5xf32>
    %cst_45 = arith.constant dense<0.000000e+00> : vector<5xf32>
    %99 = vector.multi_reduction <add>, %98, %cst_45 [1] : vector<5x5xf32> to vector<5xf32>
    %100 = vector.shape_cast %99 : vector<5xf32> to vector<5x1xf32>
    %101 = tpu.reciprocal %100 {approx = true} : vector<5x1xf32> -> vector<5x1xf32>
    %102 = vector.broadcast %101 : vector<5x1xf32> to vector<5x5xf32>
    %103 = arith.mulf %98, %102 : vector<5x5xf32>
    %cst_46 = arith.constant dense<0.000000e+00> : vector<5x8xf32>
    %104 = tpu.matmul %103, %89, %cst_46 {dimension_numbers = #tpu.dot_dimension_numbers<[1], [0], [0], [1], [0, 0, 1, 1], [], []>} : vector<5x5xf32>, vector<5x8xf32>, vector<5x8xf32> -> vector<5x8xf32>
    %105 = vector.extract_strided_slice %41 {offsets = [2, 0, 0], sizes = [1, 8, 32], strides = [1, 1, 1]} : vector<4x8x32xf32> to vector<1x8x32xf32>
    %106 = vector.shape_cast %105 : vector<1x8x32xf32> to vector<8x32xf32>
    %cst_47 = arith.constant dense<0.000000e+00> : vector<5x32xf32>
    %107 = tpu.matmul %104, %106, %cst_47 {dimension_numbers = #tpu.dot_dimension_numbers<[1], [0], [0], [1], [0, 0, 1, 1], [], []>} : vector<5x8xf32>, vector<8x32xf32>, vector<5x32xf32> -> vector<5x32xf32>
    %108 = arith.addf %86, %107 : vector<5x32xf32>
    %109 = vector.extract_strided_slice %39 {offsets = [0, 24], sizes = [5, 8], strides = [1, 1]} : vector<5x96xf32> to vector<5x8xf32>
    %110 = vector.extract_strided_slice %39 {offsets = [0, 56], sizes = [5, 8], strides = [1, 1]} : vector<5x96xf32> to vector<5x8xf32>
    %111 = vector.extract_strided_slice %39 {offsets = [0, 88], sizes = [5, 8], strides = [1, 1]} : vector<5x96xf32> to vector<5x8xf32>
    %112 = tpu.transpose %110, [1, 0] : vector<5x8xf32> -> vector<8x5xf32>
    %cst_48 = arith.constant dense<0.000000e+00> : vector<5x5xf32>
    %113 = tpu.matmul %109, %112, %cst_48 {dimension_numbers = #tpu.dot_dimension_numbers<[1], [0], [0], [1], [0, 0, 1, 1], [], []>} : vector<5x8xf32>, vector<8x5xf32>, vector<5x5xf32> -> vector<5x5xf32>
    %cst_49 = arith.constant 0.353553385 : f32
    %114 = vector.broadcast %cst_49 : f32 to vector<5x5xf32>
    %115 = arith.mulf %113, %114 : vector<5x5xf32>
    %cst_50 = arith.constant dense<0xFF800000> : vector<5xf32>
    %116 = vector.multi_reduction <maximumf>, %115, %cst_50 [1] : vector<5x5xf32> to vector<5xf32>
    %117 = vector.shape_cast %116 : vector<5xf32> to vector<5x1xf32>
    %118 = vector.broadcast %117 : vector<5x1xf32> to vector<5x5xf32>
    %119 = arith.subf %115, %118 : vector<5x5xf32>
    %120 = math.exp %119 : vector<5x5xf32>
    %cst_51 = arith.constant dense<0.000000e+00> : vector<5xf32>
    %121 = vector.multi_reduction <add>, %120, %cst_51 [1] : vector<5x5xf32> to vector<5xf32>
    %122 = vector.shape_cast %121 : vector<5xf32> to vector<5x1xf32>
    %123 = tpu.reciprocal %122 {approx = true} : vector<5x1xf32> -> vector<5x1xf32>
    %124 = vector.broadcast %123 : vector<5x1xf32> to vector<5x5xf32>
    %125 = arith.mulf %120, %124 : vector<5x5xf32>
    %cst_52 = arith.constant dense<0.000000e+00> : vector<5x8xf32>
    %126 = tpu.matmul %125, %111, %cst_52 {dimension_numbers = #tpu.dot_dimension_numbers<[1], [0], [0], [1], [0, 0, 1, 1], [], []>} : vector<5x5xf32>, vector<5x8xf32>, vector<5x8xf32> -> vector<5x8xf32>
    %127 = vector.extract_strided_slice %41 {offsets = [3, 0, 0], sizes = [1, 8, 32], strides = [1, 1, 1]} : vector<4x8x32xf32> to vector<1x8x32xf32>
    %128 = vector.shape_cast %127 : vector<1x8x32xf32> to vector<8x32xf32>
    %cst_53 = arith.constant dense<0.000000e+00> : vector<5x32xf32>
    %129 = tpu.matmul %126, %128, %cst_53 {dimension_numbers = #tpu.dot_dimension_numbers<[1], [0], [0], [1], [0, 0, 1, 1], [], []>} : vector<5x8xf32>, vector<8x32xf32>, vector<5x32xf32> -> vector<5x32xf32>
    %130 = arith.addf %108, %129 : vector<5x32xf32>
    %131 = arith.addf %6, %130 : vector<5x32xf32>
    %c0_54 = arith.constant 0 : index
    %c0_55 = arith.constant 0 : index
    %c0_56 = arith.constant 0 : index
    %132 = vector.load %arg9[%c0_54, %c0_55, %c0_56] : memref<2x1x32xf32, #tpu.memory_space<vmem>>, vector<1x1x32xf32>
    %133 = vector.shape_cast %132 : vector<1x1x32xf32> to vector<1x32xf32>
    %134 = vector.broadcast %133 : vector<1x32xf32> to vector<5x32xf32>
    %135 = arith.addf %131, %134 : vector<5x32xf32>
    %c0_57 = arith.constant 0 : index
    %c0_58 = arith.constant 0 : index
    %c0_59 = arith.constant 0 : index
    %136 = vector.load %arg10[%c0_57, %c0_58, %c0_59] : memref<2x1x32xf32, #tpu.memory_space<vmem>>, vector<1x1x32xf32>
    %137 = vector.shape_cast %136 : vector<1x1x32xf32> to vector<1x32xf32>
    %c0_60 = arith.constant 0 : index
    %c0_61 = arith.constant 0 : index
    %c0_62 = arith.constant 0 : index
    %138 = vector.load %arg11[%c0_60, %c0_61, %c0_62] : memref<2x1x32xf32, #tpu.memory_space<vmem>>, vector<1x1x32xf32>
    %139 = vector.shape_cast %138 : vector<1x1x32xf32> to vector<1x32xf32>
    %cst_63 = arith.constant dense<0.000000e+00> : vector<5xf32>
    %140 = vector.multi_reduction <add>, %135, %cst_63 [1] : vector<5x32xf32> to vector<5xf32>
    %141 = vector.shape_cast %140 : vector<5xf32> to vector<5x1xf32>
    %cst_64 = arith.constant 3.200000e+01 : f32
    %142 = vector.broadcast %cst_64 : f32 to vector<5x1xf32>
    %143 = arith.divf %141, %142 : vector<5x1xf32>
    %144 = vector.broadcast %143 : vector<5x1xf32> to vector<5x32xf32>
    %145 = arith.subf %135, %144 : vector<5x32xf32>
    %146 = arith.mulf %145, %145 : vector<5x32xf32>
    %cst_65 = arith.constant dense<0.000000e+00> : vector<5xf32>
    %147 = vector.multi_reduction <add>, %146, %cst_65 [1] : vector<5x32xf32> to vector<5xf32>
    %148 = vector.shape_cast %147 : vector<5xf32> to vector<5x1xf32>
    %cst_66 = arith.constant 3.200000e+01 : f32
    %149 = vector.broadcast %cst_66 : f32 to vector<5x1xf32>
    %150 = arith.divf %148, %149 : vector<5x1xf32>
    %151 = vector.broadcast %143 : vector<5x1xf32> to vector<5x32xf32>
    %152 = arith.subf %135, %151 : vector<5x32xf32>
    %cst_67 = arith.constant 9.99999997E-7 : f32
    %153 = vector.broadcast %cst_67 : f32 to vector<5x1xf32>
    %154 = arith.addf %150, %153 : vector<5x1xf32>
    %155 = math.rsqrt %154 : vector<5x1xf32>
    %156 = vector.broadcast %155 : vector<5x1xf32> to vector<5x32xf32>
    %157 = arith.mulf %152, %156 : vector<5x32xf32>
    %158 = vector.broadcast %137 : vector<1x32xf32> to vector<5x32xf32>
    %159 = arith.mulf %157, %158 : vector<5x32xf32>
    %160 = vector.broadcast %139 : vector<1x32xf32> to vector<5x32xf32>
    %161 = arith.addf %159, %160 : vector<5x32xf32>
    %c0_68 = arith.constant 0 : index
    %c0_69 = arith.constant 0 : index
    %c0_70 = arith.constant 0 : index
    %162 = vector.load %arg12[%c0_68, %c0_69, %c0_70] : memref<2x32x64xf32, #tpu.memory_space<vmem>>, vector<1x32x64xf32>
    %163 = vector.shape_cast %162 : vector<1x32x64xf32> to vector<32x64xf32>
    %cst_71 = arith.constant dense<0.000000e+00> : vector<5x64xf32>
    %164 = tpu.matmul %161, %163, %cst_71 {dimension_numbers = #tpu.dot_dimension_numbers<[1], [0], [0], [1], [0, 0, 1, 1], [], []>} : vector<5x32xf32>, vector<32x64xf32>, vector<5x64xf32> -> vector<5x64xf32>
    %c0_72 = arith.constant 0 : index
    %c0_73 = arith.constant 0 : index
    %c0_74 = arith.constant 0 : index
    %165 = vector.load %arg13[%c0_72, %c0_73, %c0_74] : memref<2x1x64xf32, #tpu.memory_space<vmem>>, vector<1x1x64xf32>
    %166 = vector.shape_cast %165 : vector<1x1x64xf32> to vector<1x64xf32>
    %167 = vector.broadcast %166 : vector<1x64xf32> to vector<5x64xf32>
    %168 = arith.addf %164, %167 : vector<5x64xf32>
    %cst_75 = arith.constant 5.000000e-01 : f32
    %169 = vector.broadcast %cst_75 : f32 to vector<5x64xf32>
    %170 = arith.mulf %169, %168 : vector<5x64xf32>
    %cst_76 = arith.constant 0.707106769 : f32
    %171 = vector.broadcast %cst_76 : f32 to vector<5x64xf32>
    %172 = arith.mulf %168, %171 : vector<5x64xf32>
    %173 = math.erf %172 : vector<5x64xf32>
    %cst_77 = arith.constant 1.000000e+00 : f32
    %174 = vector.broadcast %cst_77 : f32 to vector<5x64xf32>
    %175 = arith.addf %174, %173 : vector<5x64xf32>
    %176 = arith.mulf %170, %175 : vector<5x64xf32>
    %c0_78 = arith.constant 0 : index
    %c0_79 = arith.constant 0 : index
    %c0_80 = arith.constant 0 : index
    %177 = vector.load %arg14[%c0_78, %c0_79, %c0_80] : memref<2x64x32xf32, #tpu.memory_space<vmem>>, vector<1x64x32xf32>
    %178 = vector.shape_cast %177 : vector<1x64x32xf32> to vector<64x32xf32>
    %cst_81 = arith.constant dense<0.000000e+00> : vector<5x32xf32>
    %179 = tpu.matmul %176, %178, %cst_81 {dimension_numbers = #tpu.dot_dimension_numbers<[1], [0], [0], [1], [0, 0, 1, 1], [], []>} : vector<5x64xf32>, vector<64x32xf32>, vector<5x32xf32> -> vector<5x32xf32>
    %c0_82 = arith.constant 0 : index
    %c0_83 = arith.constant 0 : index
    %c0_84 = arith.constant 0 : index
    %180 = vector.load %arg15[%c0_82, %c0_83, %c0_84] : memref<2x1x32xf32, #tpu.memory_space<vmem>>, vector<1x1x32xf32>
    %181 = vector.shape_cast %180 : vector<1x1x32xf32> to vector<1x32xf32>
    %182 = vector.broadcast %181 : vector<1x32xf32> to vector<5x32xf32>
    %183 = arith.addf %179, %182 : vector<5x32xf32>
    %184 = arith.addf %135, %183 : vector<5x32xf32>
    %c1 = arith.constant 1 : index
    %c0_85 = arith.constant 0 : index
    %c0_86 = arith.constant 0 : index
    %185 = vector.load %arg4[%c1, %c0_85, %c0_86] : memref<2x1x32xf32, #tpu.memory_space<vmem>>, vector<1x1x32xf32>
    %186 = vector.shape_cast %185 : vector<1x1x32xf32> to vector<1x32xf32>
    %c1_87 = arith.constant 1 : index
    %c0_88 = arith.constant 0 : index
    %c0_89 = arith.constant 0 : index
    %187 = vector.load %arg5[%c1_87, %c0_88, %c0_89] : memref<2x1x32xf32, #tpu.memory_space<vmem>>, vector<1x1x32xf32>
    %188 = vector.shape_cast %187 : vector<1x1x32xf32> to vector<1x32xf32>
    %cst_90 = arith.constant dense<0.000000e+00> : vector<5xf32>
    %189 = vector.multi_reduction <add>, %184, %cst_90 [1] : vector<5x32xf32> to vector<5xf32>
    %190 = vector.shape_cast %189 : vector<5xf32> to vector<5x1xf32>
    %cst_91 = arith.constant 3.200000e+01 : f32
    %191 = vector.broadcast %cst_91 : f32 to vector<5x1xf32>
    %192 = arith.divf %190, %191 : vector<5x1xf32>
    %193 = vector.broadcast %192 : vector<5x1xf32> to vector<5x32xf32>
    %194 = arith.subf %184, %193 : vector<5x32xf32>
    %195 = arith.mulf %194, %194 : vector<5x32xf32>
    %cst_92 = arith.constant dense<0.000000e+00> : vector<5xf32>
    %196 = vector.multi_reduction <add>, %195, %cst_92 [1] : vector<5x32xf32> to vector<5xf32>
    %197 = vector.shape_cast %196 : vector<5xf32> to vector<5x1xf32>
    %cst_93 = arith.constant 3.200000e+01 : f32
    %198 = vector.broadcast %cst_93 : f32 to vector<5x1xf32>
    %199 = arith.divf %197, %198 : vector<5x1xf32>
    %200 = vector.broadcast %192 : vector<5x1xf32> to vector<5x32xf32>
    %201 = arith.subf %184, %200 : vector<5x32xf32>
    %cst_94 = arith.constant 9.99999997E-7 : f32
    %202 = vector.broadcast %cst_94 : f32 to vector<5x1xf32>
    %203 = arith.addf %199, %202 : vector<5x1xf32>
    %204 = math.rsqrt %203 : vector<5x1xf32>
    %205 = vector.broadcast %204 : vector<5x1xf32> to vector<5x32xf32>
    %206 = arith.mulf %201, %205 : vector<5x32xf32>
    %207 = vector.broadcast %186 : vector<1x32xf32> to vector<5x32xf32>
    %208 = arith.mulf %206, %207 : vector<5x32xf32>
    %209 = vector.broadcast %188 : vector<1x32xf32> to vector<5x32xf32>
    %210 = arith.addf %208, %209 : vector<5x32xf32>
    %c1_95 = arith.constant 1 : index
    %c0_96 = arith.constant 0 : index
    %c0_97 = arith.constant 0 : index
    %211 = vector.load %arg6[%c1_95, %c0_96, %c0_97] : memref<2x32x96xf32, #tpu.memory_space<vmem>>, vector<1x32x96xf32>
    %212 = vector.shape_cast %211 : vector<1x32x96xf32> to vector<32x96xf32>
    %cst_98 = arith.constant dense<0.000000e+00> : vector<5x96xf32>
    %213 = tpu.matmul %210, %212, %cst_98 {dimension_numbers = #tpu.dot_dimension_numbers<[1], [0], [0], [1], [0, 0, 1, 1], [], []>} : vector<5x32xf32>, vector<32x96xf32>, vector<5x96xf32> -> vector<5x96xf32>
    %c1_99 = arith.constant 1 : index
    %c0_100 = arith.constant 0 : index
    %c0_101 = arith.constant 0 : index
    %214 = vector.load %arg7[%c1_99, %c0_100, %c0_101] : memref<2x1x96xf32, #tpu.memory_space<vmem>>, vector<1x1x96xf32>
    %215 = vector.shape_cast %214 : vector<1x1x96xf32> to vector<1x96xf32>
    %216 = vector.broadcast %215 : vector<1x96xf32> to vector<5x96xf32>
    %217 = arith.addf %213, %216 : vector<5x96xf32>
    %c1_102 = arith.constant 1 : index
    %c0_103 = arith.constant 0 : index
    %c0_104 = arith.constant 0 : index
    %c0_105 = arith.constant 0 : index
    %218 = vector.load %arg8[%c1_102, %c0_103, %c0_104, %c0_105] : memref<2x4x8x32xf32, #tpu.memory_space<vmem>>, vector<1x4x8x32xf32>
    %219 = vector.shape_cast %218 : vector<1x4x8x32xf32> to vector<4x8x32xf32>
    %cst_106 = arith.constant 0.000000e+00 : f32
    %220 = vector.broadcast %cst_106 : f32 to vector<5x32xf32>
    %221 = vector.extract_strided_slice %217 {offsets = [0, 0], sizes = [5, 8], strides = [1, 1]} : vector<5x96xf32> to vector<5x8xf32>
    %222 = vector.extract_strided_slice %217 {offsets = [0, 32], sizes = [5, 8], strides = [1, 1]} : vector<5x96xf32> to vector<5x8xf32>
    %223 = vector.extract_strided_slice %217 {offsets = [0, 64], sizes = [5, 8], strides = [1, 1]} : vector<5x96xf32> to vector<5x8xf32>
    %224 = tpu.transpose %222, [1, 0] : vector<5x8xf32> -> vector<8x5xf32>
    %cst_107 = arith.constant dense<0.000000e+00> : vector<5x5xf32>
    %225 = tpu.matmul %221, %224, %cst_107 {dimension_numbers = #tpu.dot_dimension_numbers<[1], [0], [0], [1], [0, 0, 1, 1], [], []>} : vector<5x8xf32>, vector<8x5xf32>, vector<5x5xf32> -> vector<5x5xf32>
    %cst_108 = arith.constant 0.353553385 : f32
    %226 = vector.broadcast %cst_108 : f32 to vector<5x5xf32>
    %227 = arith.mulf %225, %226 : vector<5x5xf32>
    %cst_109 = arith.constant dense<0xFF800000> : vector<5xf32>
    %228 = vector.multi_reduction <maximumf>, %227, %cst_109 [1] : vector<5x5xf32> to vector<5xf32>
    %229 = vector.shape_cast %228 : vector<5xf32> to vector<5x1xf32>
    %230 = vector.broadcast %229 : vector<5x1xf32> to vector<5x5xf32>
    %231 = arith.subf %227, %230 : vector<5x5xf32>
    %232 = math.exp %231 : vector<5x5xf32>
    %cst_110 = arith.constant dense<0.000000e+00> : vector<5xf32>
    %233 = vector.multi_reduction <add>, %232, %cst_110 [1] : vector<5x5xf32> to vector<5xf32>
    %234 = vector.shape_cast %233 : vector<5xf32> to vector<5x1xf32>
    %235 = tpu.reciprocal %234 {approx = true} : vector<5x1xf32> -> vector<5x1xf32>
    %236 = vector.broadcast %235 : vector<5x1xf32> to vector<5x5xf32>
    %237 = arith.mulf %232, %236 : vector<5x5xf32>
    %cst_111 = arith.constant dense<0.000000e+00> : vector<5x8xf32>
    %238 = tpu.matmul %237, %223, %cst_111 {dimension_numbers = #tpu.dot_dimension_numbers<[1], [0], [0], [1], [0, 0, 1, 1], [], []>} : vector<5x5xf32>, vector<5x8xf32>, vector<5x8xf32> -> vector<5x8xf32>
    %239 = vector.extract_strided_slice %219 {offsets = [0, 0, 0], sizes = [1, 8, 32], strides = [1, 1, 1]} : vector<4x8x32xf32> to vector<1x8x32xf32>
    %240 = vector.shape_cast %239 : vector<1x8x32xf32> to vector<8x32xf32>
    %cst_112 = arith.constant dense<0.000000e+00> : vector<5x32xf32>
    %241 = tpu.matmul %238, %240, %cst_112 {dimension_numbers = #tpu.dot_dimension_numbers<[1], [0], [0], [1], [0, 0, 1, 1], [], []>} : vector<5x8xf32>, vector<8x32xf32>, vector<5x32xf32> -> vector<5x32xf32>
    %242 = arith.addf %220, %241 : vector<5x32xf32>
    %243 = vector.extract_strided_slice %217 {offsets = [0, 8], sizes = [5, 8], strides = [1, 1]} : vector<5x96xf32> to vector<5x8xf32>
    %244 = vector.extract_strided_slice %217 {offsets = [0, 40], sizes = [5, 8], strides = [1, 1]} : vector<5x96xf32> to vector<5x8xf32>
    %245 = vector.extract_strided_slice %217 {offsets = [0, 72], sizes = [5, 8], strides = [1, 1]} : vector<5x96xf32> to vector<5x8xf32>
    %246 = tpu.transpose %244, [1, 0] : vector<5x8xf32> -> vector<8x5xf32>
    %cst_113 = arith.constant dense<0.000000e+00> : vector<5x5xf32>
    %247 = tpu.matmul %243, %246, %cst_113 {dimension_numbers = #tpu.dot_dimension_numbers<[1], [0], [0], [1], [0, 0, 1, 1], [], []>} : vector<5x8xf32>, vector<8x5xf32>, vector<5x5xf32> -> vector<5x5xf32>
    %cst_114 = arith.constant 0.353553385 : f32
    %248 = vector.broadcast %cst_114 : f32 to vector<5x5xf32>
    %249 = arith.mulf %247, %248 : vector<5x5xf32>
    %cst_115 = arith.constant dense<0xFF800000> : vector<5xf32>
    %250 = vector.multi_reduction <maximumf>, %249, %cst_115 [1] : vector<5x5xf32> to vector<5xf32>
    %251 = vector.shape_cast %250 : vector<5xf32> to vector<5x1xf32>
    %252 = vector.broadcast %251 : vector<5x1xf32> to vector<5x5xf32>
    %253 = arith.subf %249, %252 : vector<5x5xf32>
    %254 = math.exp %253 : vector<5x5xf32>
    %cst_116 = arith.constant dense<0.000000e+00> : vector<5xf32>
    %255 = vector.multi_reduction <add>, %254, %cst_116 [1] : vector<5x5xf32> to vector<5xf32>
    %256 = vector.shape_cast %255 : vector<5xf32> to vector<5x1xf32>
    %257 = tpu.reciprocal %256 {approx = true} : vector<5x1xf32> -> vector<5x1xf32>
    %258 = vector.broadcast %257 : vector<5x1xf32> to vector<5x5xf32>
    %259 = arith.mulf %254, %258 : vector<5x5xf32>
    %cst_117 = arith.constant dense<0.000000e+00> : vector<5x8xf32>
    %260 = tpu.matmul %259, %245, %cst_117 {dimension_numbers = #tpu.dot_dimension_numbers<[1], [0], [0], [1], [0, 0, 1, 1], [], []>} : vector<5x5xf32>, vector<5x8xf32>, vector<5x8xf32> -> vector<5x8xf32>
    %261 = vector.extract_strided_slice %219 {offsets = [1, 0, 0], sizes = [1, 8, 32], strides = [1, 1, 1]} : vector<4x8x32xf32> to vector<1x8x32xf32>
    %262 = vector.shape_cast %261 : vector<1x8x32xf32> to vector<8x32xf32>
    %cst_118 = arith.constant dense<0.000000e+00> : vector<5x32xf32>
    %263 = tpu.matmul %260, %262, %cst_118 {dimension_numbers = #tpu.dot_dimension_numbers<[1], [0], [0], [1], [0, 0, 1, 1], [], []>} : vector<5x8xf32>, vector<8x32xf32>, vector<5x32xf32> -> vector<5x32xf32>
    %264 = arith.addf %242, %263 : vector<5x32xf32>
    %265 = vector.extract_strided_slice %217 {offsets = [0, 16], sizes = [5, 8], strides = [1, 1]} : vector<5x96xf32> to vector<5x8xf32>
    %266 = vector.extract_strided_slice %217 {offsets = [0, 48], sizes = [5, 8], strides = [1, 1]} : vector<5x96xf32> to vector<5x8xf32>
    %267 = vector.extract_strided_slice %217 {offsets = [0, 80], sizes = [5, 8], strides = [1, 1]} : vector<5x96xf32> to vector<5x8xf32>
    %268 = tpu.transpose %266, [1, 0] : vector<5x8xf32> -> vector<8x5xf32>
    %cst_119 = arith.constant dense<0.000000e+00> : vector<5x5xf32>
    %269 = tpu.matmul %265, %268, %cst_119 {dimension_numbers = #tpu.dot_dimension_numbers<[1], [0], [0], [1], [0, 0, 1, 1], [], []>} : vector<5x8xf32>, vector<8x5xf32>, vector<5x5xf32> -> vector<5x5xf32>
    %cst_120 = arith.constant 0.353553385 : f32
    %270 = vector.broadcast %cst_120 : f32 to vector<5x5xf32>
    %271 = arith.mulf %269, %270 : vector<5x5xf32>
    %cst_121 = arith.constant dense<0xFF800000> : vector<5xf32>
    %272 = vector.multi_reduction <maximumf>, %271, %cst_121 [1] : vector<5x5xf32> to vector<5xf32>
    %273 = vector.shape_cast %272 : vector<5xf32> to vector<5x1xf32>
    %274 = vector.broadcast %273 : vector<5x1xf32> to vector<5x5xf32>
    %275 = arith.subf %271, %274 : vector<5x5xf32>
    %276 = math.exp %275 : vector<5x5xf32>
    %cst_122 = arith.constant dense<0.000000e+00> : vector<5xf32>
    %277 = vector.multi_reduction <add>, %276, %cst_122 [1] : vector<5x5xf32> to vector<5xf32>
    %278 = vector.shape_cast %277 : vector<5xf32> to vector<5x1xf32>
    %279 = tpu.reciprocal %278 {approx = true} : vector<5x1xf32> -> vector<5x1xf32>
    %280 = vector.broadcast %279 : vector<5x1xf32> to vector<5x5xf32>
    %281 = arith.mulf %276, %280 : vector<5x5xf32>
    %cst_123 = arith.constant dense<0.000000e+00> : vector<5x8xf32>
    %282 = tpu.matmul %281, %267, %cst_123 {dimension_numbers = #tpu.dot_dimension_numbers<[1], [0], [0], [1], [0, 0, 1, 1], [], []>} : vector<5x5xf32>, vector<5x8xf32>, vector<5x8xf32> -> vector<5x8xf32>
    %283 = vector.extract_strided_slice %219 {offsets = [2, 0, 0], sizes = [1, 8, 32], strides = [1, 1, 1]} : vector<4x8x32xf32> to vector<1x8x32xf32>
    %284 = vector.shape_cast %283 : vector<1x8x32xf32> to vector<8x32xf32>
    %cst_124 = arith.constant dense<0.000000e+00> : vector<5x32xf32>
    %285 = tpu.matmul %282, %284, %cst_124 {dimension_numbers = #tpu.dot_dimension_numbers<[1], [0], [0], [1], [0, 0, 1, 1], [], []>} : vector<5x8xf32>, vector<8x32xf32>, vector<5x32xf32> -> vector<5x32xf32>
    %286 = arith.addf %264, %285 : vector<5x32xf32>
    %287 = vector.extract_strided_slice %217 {offsets = [0, 24], sizes = [5, 8], strides = [1, 1]} : vector<5x96xf32> to vector<5x8xf32>
    %288 = vector.extract_strided_slice %217 {offsets = [0, 56], sizes = [5, 8], strides = [1, 1]} : vector<5x96xf32> to vector<5x8xf32>
    %289 = vector.extract_strided_slice %217 {offsets = [0, 88], sizes = [5, 8], strides = [1, 1]} : vector<5x96xf32> to vector<5x8xf32>
    %290 = tpu.transpose %288, [1, 0] : vector<5x8xf32> -> vector<8x5xf32>
    %cst_125 = arith.constant dense<0.000000e+00> : vector<5x5xf32>
    %291 = tpu.matmul %287, %290, %cst_125 {dimension_numbers = #tpu.dot_dimension_numbers<[1], [0], [0], [1], [0, 0, 1, 1], [], []>} : vector<5x8xf32>, vector<8x5xf32>, vector<5x5xf32> -> vector<5x5xf32>
    %cst_126 = arith.constant 0.353553385 : f32
    %292 = vector.broadcast %cst_126 : f32 to vector<5x5xf32>
    %293 = arith.mulf %291, %292 : vector<5x5xf32>
    %cst_127 = arith.constant dense<0xFF800000> : vector<5xf32>
    %294 = vector.multi_reduction <maximumf>, %293, %cst_127 [1] : vector<5x5xf32> to vector<5xf32>
    %295 = vector.shape_cast %294 : vector<5xf32> to vector<5x1xf32>
    %296 = vector.broadcast %295 : vector<5x1xf32> to vector<5x5xf32>
    %297 = arith.subf %293, %296 : vector<5x5xf32>
    %298 = math.exp %297 : vector<5x5xf32>
    %cst_128 = arith.constant dense<0.000000e+00> : vector<5xf32>
    %299 = vector.multi_reduction <add>, %298, %cst_128 [1] : vector<5x5xf32> to vector<5xf32>
    %300 = vector.shape_cast %299 : vector<5xf32> to vector<5x1xf32>
    %301 = tpu.reciprocal %300 {approx = true} : vector<5x1xf32> -> vector<5x1xf32>
    %302 = vector.broadcast %301 : vector<5x1xf32> to vector<5x5xf32>
    %303 = arith.mulf %298, %302 : vector<5x5xf32>
    %cst_129 = arith.constant dense<0.000000e+00> : vector<5x8xf32>
    %304 = tpu.matmul %303, %289, %cst_129 {dimension_numbers = #tpu.dot_dimension_numbers<[1], [0], [0], [1], [0, 0, 1, 1], [], []>} : vector<5x5xf32>, vector<5x8xf32>, vector<5x8xf32> -> vector<5x8xf32>
    %305 = vector.extract_strided_slice %219 {offsets = [3, 0, 0], sizes = [1, 8, 32], strides = [1, 1, 1]} : vector<4x8x32xf32> to vector<1x8x32xf32>
    %306 = vector.shape_cast %305 : vector<1x8x32xf32> to vector<8x32xf32>
    %cst_130 = arith.constant dense<0.000000e+00> : vector<5x32xf32>
    %307 = tpu.matmul %304, %306, %cst_130 {dimension_numbers = #tpu.dot_dimension_numbers<[1], [0], [0], [1], [0, 0, 1, 1], [], []>} : vector<5x8xf32>, vector<8x32xf32>, vector<5x32xf32> -> vector<5x32xf32>
    %308 = arith.addf %286, %307 : vector<5x32xf32>
    %309 = arith.addf %184, %308 : vector<5x32xf32>
    %c1_131 = arith.constant 1 : index
    %c0_132 = arith.constant 0 : index
    %c0_133 = arith.constant 0 : index
    %310 = vector.load %arg9[%c1_131, %c0_132, %c0_133] : memref<2x1x32xf32, #tpu.memory_space<vmem>>, vector<1x1x32xf32>
    %311 = vector.shape_cast %310 : vector<1x1x32xf32> to vector<1x32xf32>
    %312 = vector.broadcast %311 : vector<1x32xf32> to vector<5x32xf32>
    %313 = arith.addf %309, %312 : vector<5x32xf32>
    %c1_134 = arith.constant 1 : index
    %c0_135 = arith.constant 0 : index
    %c0_136 = arith.constant 0 : index
    %314 = vector.load %arg10[%c1_134, %c0_135, %c0_136] : memref<2x1x32xf32, #tpu.memory_space<vmem>>, vector<1x1x32xf32>
    %315 = vector.shape_cast %314 : vector<1x1x32xf32> to vector<1x32xf32>
    %c1_137 = arith.constant 1 : index
    %c0_138 = arith.constant 0 : index
    %c0_139 = arith.constant 0 : index
    %316 = vector.load %arg11[%c1_137, %c0_138, %c0_139] : memref<2x1x32xf32, #tpu.memory_space<vmem>>, vector<1x1x32xf32>
    %317 = vector.shape_cast %316 : vector<1x1x32xf32> to vector<1x32xf32>
    %cst_140 = arith.constant dense<0.000000e+00> : vector<5xf32>
    %318 = vector.multi_reduction <add>, %313, %cst_140 [1] : vector<5x32xf32> to vector<5xf32>
    %319 = vector.shape_cast %318 : vector<5xf32> to vector<5x1xf32>
    %cst_141 = arith.constant 3.200000e+01 : f32
    %320 = vector.broadcast %cst_141 : f32 to vector<5x1xf32>
    %321 = arith.divf %319, %320 : vector<5x1xf32>
    %322 = vector.broadcast %321 : vector<5x1xf32> to vector<5x32xf32>
    %323 = arith.subf %313, %322 : vector<5x32xf32>
    %324 = arith.mulf %323, %323 : vector<5x32xf32>
    %cst_142 = arith.constant dense<0.000000e+00> : vector<5xf32>
    %325 = vector.multi_reduction <add>, %324, %cst_142 [1] : vector<5x32xf32> to vector<5xf32>
    %326 = vector.shape_cast %325 : vector<5xf32> to vector<5x1xf32>
    %cst_143 = arith.constant 3.200000e+01 : f32
    %327 = vector.broadcast %cst_143 : f32 to vector<5x1xf32>
    %328 = arith.divf %326, %327 : vector<5x1xf32>
    %329 = vector.broadcast %321 : vector<5x1xf32> to vector<5x32xf32>
    %330 = arith.subf %313, %329 : vector<5x32xf32>
    %cst_144 = arith.constant 9.99999997E-7 : f32
    %331 = vector.broadcast %cst_144 : f32 to vector<5x1xf32>
    %332 = arith.addf %328, %331 : vector<5x1xf32>
    %333 = math.rsqrt %332 : vector<5x1xf32>
    %334 = vector.broadcast %333 : vector<5x1xf32> to vector<5x32xf32>
    %335 = arith.mulf %330, %334 : vector<5x32xf32>
    %336 = vector.broadcast %315 : vector<1x32xf32> to vector<5x32xf32>
    %337 = arith.mulf %335, %336 : vector<5x32xf32>
    %338 = vector.broadcast %317 : vector<1x32xf32> to vector<5x32xf32>
    %339 = arith.addf %337, %338 : vector<5x32xf32>
    %c1_145 = arith.constant 1 : index
    %c0_146 = arith.constant 0 : index
    %c0_147 = arith.constant 0 : index
    %340 = vector.load %arg12[%c1_145, %c0_146, %c0_147] : memref<2x32x64xf32, #tpu.memory_space<vmem>>, vector<1x32x64xf32>
    %341 = vector.shape_cast %340 : vector<1x32x64xf32> to vector<32x64xf32>
    %cst_148 = arith.constant dense<0.000000e+00> : vector<5x64xf32>
    %342 = tpu.matmul %339, %341, %cst_148 {dimension_numbers = #tpu.dot_dimension_numbers<[1], [0], [0], [1], [0, 0, 1, 1], [], []>} : vector<5x32xf32>, vector<32x64xf32>, vector<5x64xf32> -> vector<5x64xf32>
    %c1_149 = arith.constant 1 : index
    %c0_150 = arith.constant 0 : index
    %c0_151 = arith.constant 0 : index
    %343 = vector.load %arg13[%c1_149, %c0_150, %c0_151] : memref<2x1x64xf32, #tpu.memory_space<vmem>>, vector<1x1x64xf32>
    %344 = vector.shape_cast %343 : vector<1x1x64xf32> to vector<1x64xf32>
    %345 = vector.broadcast %344 : vector<1x64xf32> to vector<5x64xf32>
    %346 = arith.addf %342, %345 : vector<5x64xf32>
    %cst_152 = arith.constant 5.000000e-01 : f32
    %347 = vector.broadcast %cst_152 : f32 to vector<5x64xf32>
    %348 = arith.mulf %347, %346 : vector<5x64xf32>
    %cst_153 = arith.constant 0.707106769 : f32
    %349 = vector.broadcast %cst_153 : f32 to vector<5x64xf32>
    %350 = arith.mulf %346, %349 : vector<5x64xf32>
    %351 = math.erf %350 : vector<5x64xf32>
    %cst_154 = arith.constant 1.000000e+00 : f32
    %352 = vector.broadcast %cst_154 : f32 to vector<5x64xf32>
    %353 = arith.addf %352, %351 : vector<5x64xf32>
    %354 = arith.mulf %348, %353 : vector<5x64xf32>
    %c1_155 = arith.constant 1 : index
    %c0_156 = arith.constant 0 : index
    %c0_157 = arith.constant 0 : index
    %355 = vector.load %arg14[%c1_155, %c0_156, %c0_157] : memref<2x64x32xf32, #tpu.memory_space<vmem>>, vector<1x64x32xf32>
    %356 = vector.shape_cast %355 : vector<1x64x32xf32> to vector<64x32xf32>
    %cst_158 = arith.constant dense<0.000000e+00> : vector<5x32xf32>
    %357 = tpu.matmul %354, %356, %cst_158 {dimension_numbers = #tpu.dot_dimension_numbers<[1], [0], [0], [1], [0, 0, 1, 1], [], []>} : vector<5x64xf32>, vector<64x32xf32>, vector<5x32xf32> -> vector<5x32xf32>
    %c1_159 = arith.constant 1 : index
    %c0_160 = arith.constant 0 : index
    %c0_161 = arith.constant 0 : index
    %358 = vector.load %arg15[%c1_159, %c0_160, %c0_161] : memref<2x1x32xf32, #tpu.memory_space<vmem>>, vector<1x1x32xf32>
    %359 = vector.shape_cast %358 : vector<1x1x32xf32> to vector<1x32xf32>
    %360 = vector.broadcast %359 : vector<1x32xf32> to vector<5x32xf32>
    %361 = arith.addf %357, %360 : vector<5x32xf32>
    %362 = arith.addf %313, %361 : vector<5x32xf32>
    %363 = vector.extract_strided_slice %362 {offsets = [0, 0], sizes = [1, 32], strides = [1, 1]} : vector<5x32xf32> to vector<1x32xf32>
    %c0_162 = arith.constant 0 : index
    %c0_163 = arith.constant 0 : index
    %364 = vector.load %arg16[%c0_162, %c0_163] : memref<1x32xf32, #tpu.memory_space<vmem>>, vector<1x32xf32>
    %c0_164 = arith.constant 0 : index
    %c0_165 = arith.constant 0 : index
    %365 = vector.load %arg17[%c0_164, %c0_165] : memref<1x32xf32, #tpu.memory_space<vmem>>, vector<1x32xf32>
    %cst_166 = arith.constant dense<0.000000e+00> : vector<1xf32>
    %366 = vector.multi_reduction <add>, %363, %cst_166 [1] : vector<1x32xf32> to vector<1xf32>
    %367 = vector.shape_cast %366 : vector<1xf32> to vector<1x1xf32>
    %cst_167 = arith.constant 3.200000e+01 : f32
    %368 = vector.broadcast %cst_167 : f32 to vector<1x1xf32>
    %369 = arith.divf %367, %368 : vector<1x1xf32>
    %370 = vector.broadcast %369 : vector<1x1xf32> to vector<1x32xf32>
    %371 = arith.subf %363, %370 : vector<1x32xf32>
    %372 = arith.mulf %371, %371 : vector<1x32xf32>
    %cst_168 = arith.constant dense<0.000000e+00> : vector<1xf32>
    %373 = vector.multi_reduction <add>, %372, %cst_168 [1] : vector<1x32xf32> to vector<1xf32>
    %374 = vector.shape_cast %373 : vector<1xf32> to vector<1x1xf32>
    %cst_169 = arith.constant 3.200000e+01 : f32
    %375 = vector.broadcast %cst_169 : f32 to vector<1x1xf32>
    %376 = arith.divf %374, %375 : vector<1x1xf32>
    %377 = vector.broadcast %369 : vector<1x1xf32> to vector<1x32xf32>
    %378 = arith.subf %363, %377 : vector<1x32xf32>
    %cst_170 = arith.constant 9.99999997E-7 : f32
    %379 = vector.broadcast %cst_170 : f32 to vector<1x1xf32>
    %380 = arith.addf %376, %379 : vector<1x1xf32>
    %381 = math.rsqrt %380 : vector<1x1xf32>
    %382 = vector.broadcast %381 : vector<1x1xf32> to vector<1x32xf32>
    %383 = arith.mulf %378, %382 : vector<1x32xf32>
    %384 = arith.mulf %383, %364 : vector<1x32xf32>
    %385 = arith.addf %384, %365 : vector<1x32xf32>
    %c0_171 = arith.constant 0 : index
    %c0_172 = arith.constant 0 : index
    %386 = vector.load %arg18[%c0_171, %c0_172] : memref<32x128xf32, #tpu.memory_space<vmem>>, vector<32x128xf32>
    %cst_173 = arith.constant dense<0.000000e+00> : vector<1x128xf32>
    %387 = tpu.matmul %385, %386, %cst_173 {dimension_numbers = #tpu.dot_dimension_numbers<[1], [0], [0], [1], [0, 0, 1, 1], [], []>} : vector<1x32xf32>, vector<32x128xf32>, vector<1x128xf32> -> vector<1x128xf32>
    %c0_174 = arith.constant 0 : index
    %c0_175 = arith.constant 0 : index
    %388 = vector.load %arg19[%c0_174, %c0_175] : memref<1x128xf32, #tpu.memory_space<vmem>>, vector<1x128xf32>
    %389 = arith.addf %387, %388 : vector<1x128xf32>
    %c0_176 = arith.constant 0 : index
    %c0_177 = arith.constant 0 : index
    %c0_178 = arith.constant 0 : index
    %390 = vector.load %arg20[%c0_176, %c0_177, %c0_178] : memref<1x1x128xf32, #tpu.memory_space<vmem>>, vector<1x1x128xf32>
    %391 = vector.shape_cast %390 : vector<1x1x128xf32> to vector<1x128xf32>
    %392 = vector.shape_cast %389 : vector<1x128xf32> to vector<1x1x128xf32>
    tpu.vector_store %arg20[%c0_176, %c0_177, %c0_178], %392 {strides = array<i32>} : memref<1x1x128xf32, #tpu.memory_space<vmem>>, vector<1x1x128xf32>,
    return
  }
  func.func @transform_0(%arg0: i32) -> (i32, i32, i32) {
    %c0_i32 = arith.constant 0 : i32
    %c0_i32_0 = arith.constant 0 : i32
    %c0_i32_1 = arith.constant 0 : i32
    return %arg0, %c0_i32, %c0_i32_0 : i32, i32, i32
  }
  func.func @transform_1(%arg0: i32) -> (i32, i32) {
    %c0_i32 = arith.constant 0 : i32
    %c0_i32_0 = arith.constant 0 : i32
    %c0_i32_1 = arith.constant 0 : i32
    return %c0_i32, %c0_i32_0 : i32, i32
  }
  func.func @transform_2(%arg0: i32) -> (i32, i32, i32) {
    %c0_i32 = arith.constant 0 : i32
    %c0_i32_0 = arith.constant 0 : i32
    %c0_i32_1 = arith.constant 0 : i32
    %c0_i32_2 = arith.constant 0 : i32
    return %c0_i32, %c0_i32_0, %c0_i32_1 : i32, i32, i32
  }
  func.func @transform_3(%arg0: i32) -> (i32, i32, i32) {
    %c0_i32 = arith.constant 0 : i32
    %c0_i32_0 = arith.constant 0 : i32
    %c0_i32_1 = arith.constant 0 : i32
    %c0_i32_2 = arith.constant 0 : i32
    return %c0_i32, %c0_i32_0, %c0_i32_1 : i32, i32, i32
  }
  func.func @transform_4(%arg0: i32) -> (i32, i32, i32) {
    %c0_i32 = arith.constant 0 : i32
    %c0_i32_0 = arith.constant 0 : i32
    %c0_i32_1 = arith.constant 0 : i32
    %c0_i32_2 = arith.constant 0 : i32
    return %c0_i32, %c0_i32_0, %c0_i32_1 : i32, i32, i32
  }
  func.func @transform_5(%arg0: i32) -> (i32, i32, i32) {
    %c0_i32 = arith.constant 0 : i32
    %c0_i32_0 = arith.constant 0 : i32
    %c0_i32_1 = arith.constant 0 : i32
    %c0_i32_2 = arith.constant 0 : i32
    return %c0_i32, %c0_i32_0, %c0_i32_1 : i32, i32, i32
  }
  func.func @transform_6(%arg0: i32) -> (i32, i32, i32) {
    %c0_i32 = arith.constant 0 : i32
    %c0_i32_0 = arith.constant 0 : i32
    %c0_i32_1 = arith.constant 0 : i32
    %c0_i32_2 = arith.constant 0 : i32
    return %c0_i32, %c0_i32_0, %c0_i32_1 : i32, i32, i32
  }
  func.func @transform_7(%arg0: i32) -> (i32, i32, i32, i32) {
    %c0_i32 = arith.constant 0 : i32
    %c0_i32_0 = arith.constant 0 : i32
    %c0_i32_1 = arith.constant 0 : i32
    %c0_i32_2 = arith.constant 0 : i32
    %c0_i32_3 = arith.constant 0 : i32
    return %c0_i32, %c0_i32_0, %c0_i32_1, %c0_i32_2 : i32, i32, i32, i32
  }
  func.func @transform_8(%arg0: i32) -> (i32, i32, i32) {
    %c0_i32 = arith.constant 0 : i32
    %c0_i32_0 = arith.constant 0 : i32
    %c0_i32_1 = arith.constant 0 : i32
    %c0_i32_2 = arith.constant 0 : i32
    return %c0_i32, %c0_i32_0, %c0_i32_1 : i32, i32, i32
  }
  func.func @transform_9(%arg0: i32) -> (i32, i32, i32) {
    %c0_i32 = arith.constant 0 : i32
    %c0_i32_0 = arith.constant 0 : i32
    %c0_i32_1 = arith.constant 0 : i32
    %c0_i32_2 = arith.constant 0 : i32
    return %c0_i32, %c0_i32_0, %c0_i32_1 : i32, i32, i32
  }
  func.func @transform_10(%arg0: i32) -> (i32, i32, i32) {
    %c0_i32 = arith.constant 0 : i32
    %c0_i32_0 = arith.constant 0 : i32
    %c0_i32_1 = arith.constant 0 : i32
    %c0_i32_2 = arith.constant 0 : i32
    return %c0_i32, %c0_i32_0, %c0_i32_1 : i32, i32, i32
  }
  func.func @transform_11(%arg0: i32) -> (i32, i32, i32) {
    %c0_i32 = arith.constant 0 : i32
    %c0_i32_0 = arith.constant 0 : i32
    %c0_i32_1 = arith.constant 0 : i32
    %c0_i32_2 = arith.constant 0 : i32
    return %c0_i32, %c0_i32_0, %c0_i32_1 : i32, i32, i32
  }
  func.func @transform_12(%arg0: i32) -> (i32, i32, i32) {
    %c0_i32 = arith.constant 0 : i32
    %c0_i32_0 = arith.constant 0 : i32
    %c0_i32_1 = arith.constant 0 : i32
    %c0_i32_2 = arith.constant 0 : i32
    return %c0_i32, %c0_i32_0, %c0_i32_1 : i32, i32, i32
  }
  func.func @transform_13(%arg0: i32) -> (i32, i32, i32) {
    %c0_i32 = arith.constant 0 : i32
    %c0_i32_0 = arith.constant 0 : i32
    %c0_i32_1 = arith.constant 0 : i32
    %c0_i32_2 = arith.constant 0 : i32
    return %c0_i32, %c0_i32_0, %c0_i32_1 : i32, i32, i32
  }
  func.func @transform_14(%arg0: i32) -> (i32, i32, i32) {
    %c0_i32 = arith.constant 0 : i32
    %c0_i32_0 = arith.constant 0 : i32
    %c0_i32_1 = arith.constant 0 : i32
    %c0_i32_2 = arith.constant 0 : i32
    return %c0_i32, %c0_i32_0, %c0_i32_1 : i32, i32, i32
  }
  func.func @transform_15(%arg0: i32) -> (i32, i32) {
    %c0_i32 = arith.constant 0 : i32
    %c0_i32_0 = arith.constant 0 : i32
    %c0_i32_1 = arith.constant 0 : i32
    return %c0_i32, %c0_i32_0 : i32, i32
  }
  func.func @transform_16(%arg0: i32) -> (i32, i32) {
    %c0_i32 = arith.constant 0 : i32
    %c0_i32_0 = arith.constant 0 : i32
    %c0_i32_1 = arith.constant 0 : i32
    return %c0_i32, %c0_i32_0 : i32, i32
  }
  func.func @transform_17(%arg0: i32) -> (i32, i32) {
    %c0_i32 = arith.constant 0 : i32
    %c0_i32_0 = arith.constant 0 : i32
    %c0_i32_1 = arith.constant 0 : i32
    return %c0_i32, %c0_i32_0 : i32, i32
  }
  func.func @transform_18(%arg0: i32) -> (i32, i32) {
    %c0_i32 = arith.constant 0 : i32
    %c0_i32_0 = arith.constant 0 : i32
    %c0_i32_1 = arith.constant 0 : i32
    return %c0_i32, %c0_i32_0 : i32, i32
  }
  func.func @transform_19(%arg0: i32) -> (i32, i32, i32) {
    %c0_i32 = arith.constant 0 : i32
    %c0_i32_0 = arith.constant 0 : i32
    %c0_i32_1 = arith.constant 0 : i32
    return %arg0, %c0_i32, %c0_i32_0 : i32, i32, i32
  }
}

</mosaic_0001>

<bundles_post_ra>
// kernel: vit_forward.1
= control target key start
LH: loop header
LB: loop body
LE: loop exit
PB: predicated region body
PF: predicated region fallthrough
CT: control target
= control target key end

     0   :  { %s5373_s0 = inlined_call_operand.vmem [shape: f32[2,5,588], index: 0, kind: input, shape index: {}]   ;;  %s5374_s1 = inlined_call_operand.vmem [shape: f32[588,32], index: 1, kind: input, shape index: {}]   ;;  %s5375_s2 = inlined_call_operand.vmem [shape: f32[1,5,32], index: 2, kind: input, shape index: {}]   ;;  %s5376_s3 = inlined_call_operand.vmem [shape: f32[2,1,32], index: 3, kind: input, shape index: {}]   ;;  %s5377_s4 = inlined_call_operand.vmem [shape: f32[2,1,32], index: 4, kind: input, shape index: {}]   ;;  %s5378_s5 = inlined_call_operand.vmem [shape: f32[2,32,96], index: 5, kind: input, shape index: {}]   ;;  %s5379_s6 = inlined_call_operand.vmem [shape: f32[2,1,96], index: 6, kind: input, shape index: {}]   ;;  %s5380_s7 = inlined_call_operand.vmem [shape: f32[2,4,8,32], index: 7, kind: input, shape index: {}]   ;;  %s5381_s8 = inlined_call_operand.vmem [shape: f32[2,1,32], index: 8, kind: input, shape index: {}]   ;;  %s5382_s9 = inlined_call_operand.vmem [shape: f32[2,1,32], index: 9, kind: input, shape index: {}]   ;;  %s5383_s10 = inlined_call_operand.vmem [shape: f32[2,1,32], index: 10, kind: input, shape index: {}]   ;;  %s5384_s11 = inlined_call_operand.vmem [shape: f32[2,32,64], index: 11, kind: input, shape index: {}]   ;;  %s5385_s12 = inlined_call_operand.vmem [shape: f32[2,1,64], index: 12, kind: input, shape index: {}]   ;;  %s5386_s13 = inlined_call_operand.vmem [shape: f32[2,64,32], index: 13, kind: input, shape index: {}]   ;;  %s5387_s14 = inlined_call_operand.vmem [shape: f32[2,1,32], index: 14, kind: input, shape index: {}]   ;;  %s5388_s15 = inlined_call_operand.vmem [shape: f32[1,32], index: 15, kind: input, shape index: {}]   ;;  %s5389_s16 = inlined_call_operand.vmem [shape: f32[1,32], index: 16, kind: input, shape index: {}]   ;;  %s5390_s17 = inlined_call_operand.vmem [shape: f32[32,128], index: 17, kind: input, shape index: {}]   ;;  %s5391_s18 = inlined_call_operand.vmem [shape: f32[1,128], index: 18, kind: input, shape index: {}]   ;;  %s5392_s19 = inlined_call_operand.hbm [shape: f32[2,1,128], index: 19, kind: output, shape index: {}]  }
   0x1   :  { %5409 = sst [smem:[#allocation11_spill]] %s5373_s0 }
   0x2   :  { %5410 = sst [smem:[#allocation12_spill]] %s5374_s1 }
   0x3   :  { %5411 = sst [smem:[#allocation13_spill]] %s5375_s2 }
   0x4   :  { %5412 = sst [smem:[#allocation14_spill]] %s5376_s3 }
   0x5   :  { %5413 = sst [smem:[#allocation15_spill]] %s5391_s18 }
   0x6   :  { %5414 = sst [smem:[#allocation16_spill]] %s5392_s19 }
   0x7   :  { %24 = vsyncpa [#allocation3], 0 }
   0x8   :  { %26 = vsyncpa [#allocation3 + $0x1], 0  ;;  %s4595_s0 = smov 0   ;;  %s4597_s30 = smov 0  }
   0x9   :  { %s4599_s20 = smov 0   ;;  %s4601_s21 = smov 0  }
   0xa LB: > { %5415 = sst [smem:[#allocation5_spill]] %s4465_s0  ;;  %s4616_s1 = sadd.s32 4294967295, %s4477_s21   ;;  %s4477_s21 = sphi %s4601_s21, %s5440_s21   ;;  %s4473_s20 = sphi %s4599_s20, %s5445_s20   ;;  %s4469_s30 = sphi %s4597_s30, %s5444_s30   ;;  %s4465_s0 = sphi %s4595_s0, %s5443_s0  }
   0xb   : > { %5416 = sst [smem:[#allocation6_spill]] %s4473_s20  ;;  %s3671_s22 = sadd.s32 4294967294, %s4477_s21  }
   0xc   : > { %5417 = sst [smem:[#allocation7_spill]] %s4477_s21  ;;  %s4620_s2 = sadd.s32 1, %s4477_s21  }
   0xd   : > { %5418 = sst [smem:[#allocation8_spill]] %s4620_s2  ;;  %s443_s23 = sadd.s32 1, %s4473_s20 }
   0xe   : > { %s440_s24 = ssub.s32 %s4477_s21, %s4620_s2  ;;  %p453_p0 = scmp.ne.s32.totalorder %s4473_s20, %s4469_s30 }
   0xf   : > { %p441_p1 = scmp.eq.s32.totalorder %s440_s24, 0  ;;  %p454_p2 = scmp.eq.s32.totalorder %s4616_s1, 1 }
  0x10   : > { %p459_p3 = scmp.ne.s32.totalorder %s4469_s30, %s4465_s0  ;;  %p460_p4 = scmp.eq.s32.totalorder %s3671_s22, 1 }
  0x11   : > { %s4631_s25 = scalar_select %p441_p1, %s4473_s20, %s443_s23  }
  0x12   : > { %p4633_p5 = por %p454_p2, %p453_p0  ;;  %p4637_p6 = por %p460_p4, %p459_p3 }
  0x13   : > { %5419 = sst [smem:[#allocation9_spill]] %s4631_s25  ;;  %p3674_p7 = scmp.ge.s32.totalorder %s4477_s21, 1 }
  0x14   : > { %s5421_s26 = scalar_select %p4637_p6, 1, 0 }
  0x15   : > { %p540_p8 = scmp.lt.s32.totalorder %s4477_s21, 3 }
  0x16   : > { %5422 = sst [smem:[#allocation10_spill]] %s5421_s26 }
  0x17   : > { %p541_p9 = pnand %p3674_p7, %p540_p8 }
  0x18   : > { %s5423_s29 = sld [smem:[#allocation12_spill]] (!%p541_p9)  ;;  %p595_p10 = scmp.lt.s32.totalorder (!%p541_p9), %s4616_s1, 1  ;;  %vm4480_vm0 = vmmov (!%p541_p9), 0   ;;  %vm684_vm1 = vcmask (!%p541_p9), 1043456   ;;  %vm4482_vm2 = vmmov (!%p541_p9), 1   ;;  %vm680_vm4 = vcmask (!%p541_p9), 621568  }
  0x19   : > { %544 = sbr.rel (%p541_p9) target bundleno = 8654 (0x21ce), region = 96  ;;  %s5424_s27 = sld [smem:[#allocation11_spill]] (!%p541_p9)  ;;  %vm4258_vm3 = vmpackc.low (!%p541_p9), %vm684_vm1, %vm4482_vm2  ;;  %vm900_vm5 = vcmask (!%p541_p9), 258048   ;;  %vm940_vm6 = vcmask (!%p541_p9), 261120   ;;  %vm1021_vm7 = vcmask (!%p541_p9), 64512   ;;  %vm1115_vm8 = vcmask (!%p541_p9), 1044480  }
  0x1a   : > { %s5426_s0 = sld [smem:[#allocation14_spill]] (!%p541_p9)  ;;  %s5402_s23 = smov (!%p541_p9), 64   ;;  %vm1097_vm9 = vcmask (!%p541_p9), 36864   ;;  %vm1111_vm10 = vcmask (!%p541_p9), 39936   ;;  %vm2125_vm11 = vcmask (!%p541_p9), 523264   ;;  %vm3508_vm12 = vcmask (!%p541_p9), 253952  }
  0x1b   : > { %s4486_s19 = smov (!%p541_p9), 120   ;;  %s4487_s24 = smov (!%p541_p9), 56  }
  0x1c   : > { %s5408_s22 = smov (!%p541_p9), 80   ;;  %s5407_s2 = smov (!%p541_p9), 112  }
  0x1d   : > { %s5403_s18 = smov (!%p541_p9), 40   ;;  %s3769_s21 = sshll.u32 (!%p541_p9), %s4616_s1, 4 }
  0x1e   : > { %v621_v0 = vld [vmem:[%s5423_s29 + $0x80] sm:$0xff] (!%p541_p9)  ;;  %v622_v1 = vld [vmem:[%s5423_s29 + $0x88] sm:$0xff] (!%p541_p9)  ;;  %v623_v11 = vld [vmem:[%s5423_s29 + $0x90] sm:$0xff] (!%p541_p9) }
  0x1f   : > { %v605_v2 = vld [vmem:[%s5423_s29] sm:$0xff] (!%p541_p9)  ;;  %v4180_v3 = vpack.c.bf16 (!%p541_p9), %v622_v1, %v621_v0  ;;  %v606_v4 = vld [vmem:[%s5423_s29 + $0x8] sm:$0xff] (!%p541_p9)  ;;  %v624_v13 = vld [vmem:[%s5423_s29 + $0x98] sm:$0xff] (!%p541_p9) }
  0x20   : > { %v653_v5 = vld [vmem:[%s5423_s29 + $0x180] sm:$0xff]  ;;  %v654_v6 = vld [vmem:[%s5423_s29 + $0x188] sm:$0xff]  ;;  %v4182_v7 = vpack.c.bf16 %v606_v4, %v605_v2  ;;  %v607_v14 = vld [vmem:[%s5423_s29 + $0x10] sm:$0xff]  ;;  %v4184_v16 = vpack.c.bf16 %v624_v13, %v623_v11  ;;  %s4737_s20 = scalar_select %p595_p10, %s4616_s1, 1 }
  0x21   : > { %v4212_v8 = vpack.c.bf16 %v654_v6, %v653_v5  ;;  %v637_v9 = vld [vmem:[%s5423_s29 + $0x100] sm:$0xff]  ;;  %v638_v10 = vld [vmem:[%s5423_s29 + $0x108] sm:$0xff]  ;;  %4181 = vmatprep.subr.bf16.mxu0 %v4180_v3  ;;  %v608_v15 = vld [vmem:[%s5423_s29 + $0x18] sm:$0xff]  ;;  %s5427_s26 = smov %s5426_s0  ;;  %s4494_s1 = smov [#allocation2]  }
  0x22   : > { %v4214_v12 = vpack.c.bf16 %v638_v10, %v637_v9  ;;  %4183 = vmatpush3.bf16.msra.mxu0 %v4182_v7  ;;  %v4186_v17 = vpack.c.bf16 %v608_v15, %v607_v14  ;;  %v655_v18 = vld [vmem:[%s5423_s29 + $0x190] sm:$0xff]  ;;  %v656_v19 = vld [vmem:[%s5423_s29 + $0x198] sm:$0xff]  ;;  %v625_v23 = vld [vmem:[%s5423_s29 + $0xa0] sm:$0xff]  ;;  %s4314_s25 = smul.u32 40, %s4737_s20  ;;  %s4485_s20 = smov 88  }
  0x23   : > { %4213 = vmatprep.subr.bf16.mxu1 %v4212_v8  ;;  %v639_v20 = vld [vmem:[%s5423_s29 + $0x110] sm:$0xff]  ;;  %v4216_v21 = vpack.c.bf16 %v656_v19, %v655_v18  ;;  %v640_v22 = vld [vmem:[%s5423_s29 + $0x118] sm:$0xff]  ;;  %v626_v24 = vld [vmem:[%s5423_s29 + $0xa8] sm:$0xff]  ;;  %4185 = vmatprep.subr.bf16.mxu0 %v4184_v16 }
  0x24   : > { %4215 = vmatpush3.bf16.msra.mxu1 %v4214_v12  ;;  %v4218_v25 = vpack.c.bf16 %v640_v22, %v639_v20  ;;  %v4188_v26 = vpack.c.bf16 %v626_v24, %v625_v23  ;;  %v609_v27 = vld [vmem:[%s5423_s29 + $0x20] sm:$0xff]  ;;  %v610_v28 = vld [vmem:[%s5423_s29 + $0x28] sm:$0xff]  ;;  %v627_v35 = vld [vmem:[%s5423_s29 + $0xb0] sm:$0xff]  ;;  %s4794_s28 = scalar_lea.vmem %s5424_s27, %s4314_s25  ;;  %s5425_s25 = sld [smem:[#allocation13_spill]] }
  0x25   : > { %v657_v29 = vld [vmem:[%s5423_s29 + $0x1a0] sm:$0xff]  ;;  %4217 = vmatprep.subr.bf16.mxu1 %v4216_v21  ;;  %v658_v30 = vld [vmem:[%s5423_s29 + $0x1a8] sm:$0xff]  ;;  %v4190_v33 = vpack.c.bf16 %v610_v28, %v609_v27  ;;  %v628_v36 = vld [vmem:[%s5423_s29 + $0xb8] sm:$0xff]  ;;  %s4484_s27 = smov 96  }
  0x26   : > { %v641_v31 = vld [vmem:[%s5423_s29 + $0x120] sm:$0xff]  ;;  %v642_v32 = vld [vmem:[%s5423_s29 + $0x128] sm:$0xff]  ;;  %4187 = vmatpush3.bf16.msra.mxu0 %v4186_v17  ;;  %v4220_v34 = vpack.c.bf16 %v658_v30, %v657_v29  ;;  %v611_v37 = vld [vmem:[%s5423_s29 + $0x30] sm:$0xff]  ;;  %v4192_v39 = vpack.c.bf16 %v628_v36, %v627_v35 }
  0x27   : > { %4189 = vmatprep.subr.bf16.mxu0 %v4188_v26  ;;  %v4222_v38 = vpack.c.bf16 %v642_v32, %v641_v31  ;;  %v612_v40 = vld [vmem:[%s5423_s29 + $0x38] sm:$0xff]  ;;  %v659_v41 = vld [vmem:[%s5423_s29 + $0x1b0] sm:$0xff]  ;;  %v629_v46 = vld [vmem:[%s5423_s29 + $0xc0] sm:$0xff] }
  0x28   : > { %4219 = vmatpush3.bf16.msra.mxu1 %v4218_v25  ;;  %v660_v42 = vld [vmem:[%s5423_s29 + $0x1b8] sm:$0xff]  ;;  %v643_v44 = vld [vmem:[%s5423_s29 + $0x130] sm:$0xff]  ;;  %v630_v47 = vld [vmem:[%s5423_s29 + $0xc8] sm:$0xff]  ;;  %v4194_v48 = vpack.c.bf16 %v612_v40, %v611_v37 }
  0x29   : > { %4221 = vmatprep.subr.bf16.mxu1 %v4220_v34  ;;  %v4224_v43 = vpack.c.bf16 %v660_v42, %v659_v41  ;;  %v644_v45 = vld [vmem:[%s5423_s29 + $0x138] sm:$0xff]  ;;  %v661_v49 = vld [vmem:[%s5423_s29 + $0x1c0] sm:$0xff]  ;;  %v662_v50 = vld [vmem:[%s5423_s29 + $0x1c8] sm:$0xff]  ;;  %v4196_v52 = vpack.c.bf16 %v630_v47, %v629_v46 }
  0x2a   : > { %4191 = vmatpush3.bf16.msra.mxu0 %v4190_v33  ;;  %v4226_v51 = vpack.c.bf16 %v644_v45, %v643_v44  ;;  %v613_v53 = vld [vmem:[%s5423_s29 + $0x40] sm:$0xff]  ;;  %v614_v54 = vld [vmem:[%s5423_s29 + $0x48] sm:$0xff]  ;;  %v4228_v56 = vpack.c.bf16 %v662_v50, %v661_v49  ;;  %v631_v58 = vld [vmem:[%s5423_s29 + $0xd0] sm:$0xff]  ;;  %v4481_v45 = vmov 0.0  }
  0x2b   : > { %4193 = vmatprep.subr.bf16.mxu0 %v4192_v39  ;;  %v645_v55 = vld [vmem:[%s5423_s29 + $0x140] sm:$0xff]  ;;  %v646_v57 = vld [vmem:[%s5423_s29 + $0x148] sm:$0xff]  ;;  %v632_v59 = vld [vmem:[%s5423_s29 + $0xd8] sm:$0xff]  ;;  %v4198_v62 = vpack.c.bf16 %v614_v54, %v613_v53 }
  0x2c   : > { %4223 = vmatpush3.bf16.msra.mxu1 %v4222_v38  ;;  %v663_v60 = vld [vmem:[%s5423_s29 + $0x1d0] sm:$0xff]  ;;  %v664_v61 = vld [vmem:[%s5423_s29 + $0x1d8] sm:$0xff]  ;;  %v4230_v63 = vpack.c.bf16 %v646_v57, %v645_v55  ;;  %v4200_v0 = vpack.c.bf16 %v632_v59, %v631_v58  ;;  %v633_v6 = vld [vmem:[%s5423_s29 + $0xe0] sm:$0xff]  ;;  %v4479_v38 = vmov 0.0|0.0  }
  0x2d   : > { %4225 = vmatprep.subr.bf16.mxu1 %v4224_v43  ;;  %v615_v1 = vld [vmem:[%s5423_s29 + $0x50] sm:$0xff]  ;;  %v616_v2 = vld [vmem:[%s5423_s29 + $0x58] sm:$0xff]  ;;  %v4232_v4 = vpack.c.bf16 %v664_v61, %v663_v60  ;;  %v634_v7 = vld [vmem:[%s5423_s29 + $0xe8] sm:$0xff] }
  0x2e   : > { %4195 = vmatpush3.bf16.msra.mxu0 %v4194_v48  ;;  %v647_v3 = vld [vmem:[%s5423_s29 + $0x150] sm:$0xff]  ;;  %v648_v5 = vld [vmem:[%s5423_s29 + $0x158] sm:$0xff]  ;;  %v665_v8 = vld [vmem:[%s5423_s29 + $0x1e0] sm:$0xff]  ;;  %v4202_v10 = vpack.c.bf16 %v616_v2, %v615_v1  ;;  %v4204_v14 = vpack.c.bf16 %v634_v7, %v633_v6 }
  0x2f   : > { %4197 = vmatprep.subr.bf16.mxu0 %v4196_v52  ;;  %v666_v9 = vld [vmem:[%s5423_s29 + $0x1e8] sm:$0xff]  ;;  %v617_v11 = vld [vmem:[%s5423_s29 + $0x60] sm:$0xff]  ;;  %v4234_v13 = vpack.c.bf16 %v648_v5, %v647_v3  ;;  %v635_v19 = vld [vmem:[%s5423_s29 + $0xf0] sm:$0xff] }
  0x30   : > { %4227 = vmatpush3.bf16.msra.mxu1 %v4226_v51  ;;  %v601_v12 = vld [vmem:[%s4794_s28 + $0x8] sm:$0x1f]  ;;  %v649_v16 = vld [vmem:[%s5423_s29 + $0x160] sm:$0xff]  ;;  %v4236_v18 = vpack.c.bf16 %v666_v9, %v665_v8  ;;  %v636_v20 = vld [vmem:[%s5423_s29 + $0xf8] sm:$0xff] }
  0x31   : > { %4229 = vmatprep.subr.bf16.mxu1 %v4228_v56  ;;  %v618_v15 = vld [vmem:[%s5423_s29 + $0x68] sm:$0xff]  ;;  %752 = vmatprep.mubr.f32.mxu0 %v601_v12  ;;  %v603_v21 = vld [vmem:[%s4794_s28 + $0x18] sm:$0x1f]  ;;  %v667_v22 = vld [vmem:[%s5423_s29 + $0x1f0] sm:$0xff]  ;;  %v4208_v26 = vpack.c.bf16 %v636_v20, %v635_v19 }
  0x32   : > { %4199 = vmatpush3.bf16.msra.mxu0 %v4198_v62  ;;  %v650_v17 = vld [vmem:[%s5423_s29 + $0x168] sm:$0xff]  ;;  %v668_v23 = vld [vmem:[%s5423_s29 + $0x1f8] sm:$0xff]  ;;  %822 = vmatprep.mubr.f32.mxu1 %v603_v21  ;;  %v4206_v24 = vpack.c.bf16 %v618_v15, %v617_v11  ;;  %v619_v27 = vld [vmem:[%s5423_s29 + $0x70] sm:$0xff] }
  0x33   : > { %4201 = vmatprep.subr.bf16.mxu0 %v4200_v0  ;;  %v4238_v25 = vpack.c.bf16 %v650_v17, %v649_v16  ;;  %v620_v28 = vld [vmem:[%s5423_s29 + $0x78] sm:$0xff]  ;;  %v4240_v29 = vpack.c.bf16 %v668_v23, %v667_v22  ;;  %v651_v30 = vld [vmem:[%s5423_s29 + $0x170] sm:$0xff]  ;;  %v669_v34 = vld [vmem:[%s5423_s29 + $0x200] sm:$0xff] }
  0x34   : > { %4231 = vmatpush3.bf16.msra.mxu1 %v4230_v63  ;;  %v652_v31 = vld [vmem:[%s5423_s29 + $0x178] sm:$0xff]  ;;  %v4210_v32 = vpack.c.bf16 %v620_v28, %v619_v27  ;;  %v670_v35 = vld [vmem:[%s5423_s29 + $0x208] sm:$0xff]  ;;  %v600_v36 = vld [vmem:[%s4794_s28] sm:$0x1f] }
  0x35   : > { %4233 = vmatprep.subr.bf16.mxu1 %v4232_v4  ;;  %v4242_v33 = vpack.c.bf16 %v652_v31, %v651_v30  ;;  %v4245_v37 = vpack.c.bf16 %v670_v35, %v669_v34  ;;  %v602_v39 = vld [vmem:[%s4794_s28 + $0x10] sm:$0x1f]  ;;  %v672_v41 = vld [vmem:[%s5423_s29 + $0x218] sm:$0xff]  ;;  %v673_v43 = vld [vmem:[%s5423_s29 + $0x220] sm:$0xff] }
  0x36   : > { %4203 = vmatpush3.bf16.msra.mxu0 %v4202_v10  ;;  %v671_v40 = vld [vmem:[%s5423_s29 + $0x210] sm:$0xff]  ;;  %v674_v44 = vld [vmem:[%s5423_s29 + $0x228] sm:$0xff]  ;;  %v676_v48 = vld [vmem:[%s5423_s29 + $0x238] sm:$0xff] }
  0x37   : > { %4205 = vmatprep.subr.bf16.mxu0 %v4204_v14  ;;  %v4248_v42 = vpack.c.bf16 %v672_v41, %v671_v40  ;;  %v4251_v46 = vpack.c.bf16 %v674_v44, %v673_v43  ;;  %v675_v47 = vld [vmem:[%s5423_s29 + $0x230] sm:$0xff]  ;;  %v677_v50 = vld [vmem:[%s5423_s29 + $0x240] sm:$0xff]  ;;  %v678_v51 = vld [vmem:[%s5423_s29 + $0x248] sm:$0xf] }
  0x38   : > { %4235 = vmatpush3.bf16.msra.mxu1 %v4234_v13  ;;  %v4254_v49 = vpack.c.bf16 %v676_v48, %v675_v47  ;;  %v4257_v52 = vpack.c.bf16 %v678_v51, %v677_v50  ;;  %v604_v53 = vld [vmem:[%s4794_s28 + $0x20] sm:$0x1f]  ;;  %v930_v9 = vld [vmem:[%s5378_s5 + $0x8] sm:$0xff]  ;;  %v931_v11 = vld [vmem:[%s5378_s5 + $0x10] sm:$0xff]  ;;  %s5435_s28 = sld [smem:[#allocation15_spill]] }
  0x39   : > { %4237 = vmatprep.subr.bf16.mxu1 %v4236_v18  ;;  %v679_v55 = vld [vmem:[%s5425_s25] sm:$0x1f]  ;;  %v932_v12 = vld [vmem:[%s5378_s5 + $0x18] sm:$0xff]  ;;  %s5404_s25 = smov 72  }
  0x3a   : > { %4207 = vmatpush3.bf16.msra.mxu0 %v4206_v24  ;;  %v929_v8 = vld [vmem:[%s5378_s5] sm:$0xff]  ;;  %v4264_v13 = vpack.c.bf16 %v932_v12, %v931_v11 }
  0x3b   : > { %4209 = vmatprep.subr.bf16.mxu0 %v4208_v26  ;;  %v4261_v10 = vpack.c.bf16 %v930_v9, %v929_v8  ;;  %v3678_v18 = vld [vmem:[%s5426_s0] ss:$0 sm:$0xff]  ;;  %s5406_s0 = smov 48  }
  0x3c   : > { %4239 = vmatpush3.bf16.msra.mxu1 %v4238_v25  ;;  %v3679_v20 = vld [vmem:[%s5377_s4] ss:$0 sm:$0xff] }
  0x3d   : > { %4241 = vmatprep.subr.bf16.mxu1 %v4240_v29  ;;  %v3680_v23 = vld [vmem:[%s5379_s6] ss:$0 sm:$0xff] }
  0x3e   : > { %4211 = vmatpush3.bf16.msra.mxu0 %v4210_v32 }
  0x3f   : > { %4244 = vmatprep.subr.bf16.mxu0 %v4479_v38 }
  0x40   : > { %4243 = vmatpush3.bf16.msra.mxu1 %v4242_v33 }
  0x41   : > { %4260 = vmatprep.subr.bf16.mxu1 %v4479_v38  ;;  %753 = vmatmul.mubr.f32.vlgmr.msra.gmra.mrb[0].mxu0 %v600_v36 }
  0x42   : > { %4246 = vmatpush3.bf16.msra.mxu0 %v4245_v37  ;;  %3964 = vmatprep.mubr.msk.f32.mxu0 %vm4480_vm0, %v4481_v45 }
  0x43   : > { %823 = vmatmul.mubr.f32.vlgmr.msra.gmra.mrb[0].mxu1 %v602_v39  ;;  %4247 = vmatprep.subr.bf16.mxu0 %v4479_v38 }
  0x44   : > { %3975 = vmatprep.mubr.msk.f32.mxu1 %vm4480_vm0, %v4481_v45  ;;  %4262 = vmatpush3.bf16.msra.mxu1 %v4261_v10 }
  0x45   : > { %4263 = vmatprep.subr.bf16.mxu1 %v4479_v38 }
  0x46   : > { %4249 = vmatpush3.bf16.msra.mxu0 %v4248_v42 }
  0x47   : > { %4250 = vmatprep.subr.bf16.mxu0 %v4479_v38 }
  0x48   : > { %4265 = vmatpush3.bf16.msra.mxu1 %v4264_v13 }
  0x49   : > { %3978 = vmatprep.subr.mxu1 %v4481_v45 }
  0x4a   : > { %4252 = vmatpush3.bf16.msra.mxu0 %v4251_v46 }
  0x4b   : > { %4253 = vmatprep.subr.bf16.mxu0 %v4479_v38 }
  0x4e   : > { %4255 = vmatpush3.bf16.msra.mxu0 %v4254_v49 }
  0x4f   : > { %4256 = vmatprep.subr.bf16.mxu0 %v4479_v38 }
  0x52   : > { %4259 = vmatpush3.bf16.msk.msra.mxu0 %vm4258_vm3, %v4257_v52 }
  0x53   : > { %3993 = vmatprep.subr.mxu0 %v4481_v45 }
  0x55   : > { %3965 = vmatmul.mubr.msk.f32.vlgmr.msra.gmra.mrb[2].mxu0 %vm680_vm4, %v604_v53 }
  0x56   : > { %3995 = vmatprep.mubr.msk.f32.mxu0 %vm4480_vm0, %v4481_v45 }
 0x114   : > { %v3804_v54 = vpop.f32.mrb[0].mxu0 }
 0x115   : > { %v3805_v56 = vpop.f32.mrb[1].mxu0 }
 0x116   : > { %v3839_v57 = vpop.f32.mrb[0].mxu1  ;;  %v3806_v58 = vadd.f32 %v3805_v56, %v3804_v54 }
 0x117   : > { %v3840_v59 = vpop.f32.mrb[1].mxu1 }
 0x118   : > { %v3841_v60 = vadd.f32 %v3840_v59, %v3839_v57  ;;  %v755_v61 = vadd.f32 %v3806_v58, %v679_v55  ;;  %v1015_v57 = vld [vmem:[%s5380_s7 + $0x8] sm:$0xff] }
 0x11a   : > { %v825_v62 = vadd.f32 %v3841_v60, %v755_v61  ;;  %v1014_v61 = vld [vmem:[%s5380_s7] sm:$0xff] }
 0x128   : > { %v894_v63 = vpop.f32.mrb[2].mxu0 }
 0x129   : > { %v4898_v0 = vadd.f32 %v894_v63, %v825_v62  ;;  %v3966_v1 = vpop.f32.mrb[3].mxu0 }
 0x12b   : > { %v901_v2 = vsel %vm900_vm5, %v4898_v0, 0.0 }
 0x12c   : > { %902 = vadd.xlane.f32.xlu0 %v901_v2 }
 0x1b9   : > { %v903_v3 = vpop.xlane.xlu0 %902 }
 0x1ba   : > { %v905_v4 = vmul.f32 0.03125, %v903_v3 }
 0x1bc   : > { %v906_v5 = vsub.f32 %v4898_v0, %v905_v4 }
 0x1be   : > { %v907_v6 = vmul.f32 %v906_v5, %v906_v5 }
 0x1c0   : > { %v908_v7 = vsel %vm900_vm5, %v907_v6, 0.0 }
 0x1c1   : > { %909 = vadd.xlane.f32.xlu0 %v908_v7 }
 0x24e   : > { %v910_v14 = vpop.xlane.xlu0 %909 }
 0x24f   : > { %v911_v15 = vmul.f32 0.03125, %v910_v14 }
 0x251   : > { %v912_v16 = vadd.f32 1e-06, %v911_v15 }
 0x253   : > { %4369 = vrsqrt.f32 %v912_v16 }
 0x25d   : > { %v4370_v17 = vpop.eup %4369 }
 0x25e   : > { %v914_v19 = vmul.f32 %v4370_v17, %v906_v5 }
 0x260   : > { %v921_v21 = vmul.f32 %v3678_v18, %v914_v19 }
 0x262   : > { %v928_v22 = vadd.f32 %v3679_v20, %v921_v21 }
 0x264   : > { %3976 = vmatmul.mubr.msk.f32.vlgmr.msra.gmra.mrb[2].mxu1 %vm940_vm6, %v928_v22 }
 0x265   : > { %3980 = vmatprep.mubr.msk.f32.mxu1 %vm4480_vm0, %v4481_v45 }
 0x337   : > { %v1010_v24 = vpop.f32.mrb[2].mxu1 }
 0x338   : > { %v4930_v25 = vadd.f32 %v3680_v23, %v1010_v24  ;;  %v3977_v26 = vpop.f32.mrb[3].mxu1  ;;  %v1016_v23 = vld [vmem:[%s5380_s7 + $0x10] sm:$0xff] }
 0x33a   : > { %1109 = vrot.lane.b32.xlu0 %v4930_v25, %s5402_s23  ;;  %1019 = vrot.lane.b32.xlu1 %v4930_v25, %s4484_s27  ;;  %s5405_s23 = smov 104  }
 0x33e   : > { %1190 = vrot.lane.b32.xlu0 %v4930_v25, %s4485_s20 }
 0x3ac   : > { %v1020_v27 = vpop.permute.xlu1 %1019  ;;  %v1110_v28 = vpop.permute.xlu0 %1109 }
 0x3ad   : > { %3979 = vmatpush3.xpose.msk.msra.mxu1 %vm1021_vm7, %v1020_v27 }
 0x3ae   : > { %3983 = vmatprep.subr.mxu1 %v4481_v45 }
 0x3b0   : > { %3981 = vmatmul.mubr.msk.f32.vlgmr.msra.gmra.mrb[4].mxu1 %vm1021_vm7, %v4930_v25  ;;  %v1191_v39 = vpop.permute.xlu0 %1190 }
 0x3b1   : > { %3984 = vmatpush3.msk.msra.mxu1 %vm1115_vm8, %v1110_v28  ;;  %3985 = vmatprep.mubr.msk.f32.mxu1 %vm4480_vm0, %v4481_v45 }
 0x3b2   : > { %3988 = vmatprep.subr.mxu1 %v4481_v45 }
 0x483   : > { %v1092_v29 = vpop.f32.mrb[4].mxu1 }
 0x484   : > { %v1096_v30 = vmul.f32 0.35355338, %v1092_v29  ;;  %v3982_v31 = vpop.f32.mrb[5].mxu1 }
 0x486   : > { %v1098_v32 = vsel %vm1097_vm9, %v1096_v30, -inf }
 0x487   : > { %1099 = vmax.xlane.f32.xlu1 %v1098_v32 }
 0x514   : > { %v1100_v33 = vpop.xlane.xlu1 %1099 }
 0x515   : > { %v1101_v34 = vsub.f32 %v1096_v30, %v1100_v33 }
 0x517   : > { %v1102_v35 = vmul.f32 1.442695, %v1101_v34 }
 0x519   : > { %4371 = vpow2.f32 %v1102_v35 }
 0x523   : > { %v4372_v36 = vpop.eup %4371 }
 0x524   : > { %v1104_v37 = vsel %vm1097_vm9, %v4372_v36, 0.0 }
 0x525   : > { %1105 = vadd.xlane.f32.xlu0 %v1104_v37  ;;  %v1017_v37 = vld [vmem:[%s5380_s7 + $0x18] sm:$0xff] }
 0x53b   : > { %1188 = vrot.lane.b32.xlu0 %v4930_v25, %s4486_s19 }
 0x5b2   : > { %v1106_v40 = vpop.xlane.xlu0 %1105 }
 0x5b3   : > { %4373 = vrcp.f32 %v1106_v40 }
 0x5b6   : > { %v1189_v43 = vpop.permute.xlu0 %1188 }
 0x5bd   : > { %v4374_v41 = vpop.eup %4373 }
 0x5be   : > { %v1108_v42 = vmul.f32 %v4374_v41, %v4372_v36 }
 0x5c0   : > { %3986 = vmatmul.mubr.msk.f32.vlgmr.msra.gmra.mrb[6].mxu1 %vm1111_vm10, %v1108_v42 }
 0x5c1   : > { %3989 = vmatpush3.xpose.msk.msra.mxu1 %vm1021_vm7, %v1191_v39  ;;  %3990 = vmatprep.mubr.msk.f32.mxu1 %vm4480_vm0, %v4481_v45 }
 0x5c2   : > { %3998 = vmatprep.subr.mxu1 %v4481_v45 }
 0x5c4   : > { %3991 = vmatmul.mubr.msk.f32.vlgmr.msra.gmra.mrb[8].mxu1 %vm1021_vm7, %v1189_v43 }
 0x5c5   : > { %4000 = vmatprep.mubr.msk.f32.mxu1 %vm4480_vm0, %v4481_v45  ;;  %3999 = vmatpush3.msra.mxu1 %v1015_v57 }
 0x5c6   : > { %4008 = vmatprep.subr.mxu1 %v4481_v45 }
 0x693   : > { %v1184_v44 = vpop.f32.mrb[6].mxu1 }
 0x694   : > { %v3987_v46 = vpop.f32.mrb[7].mxu1 }
 0x697   : > { %v1262_v47 = vpop.f32.mrb[8].mxu1 }
 0x698   : > { %v1266_v48 = vmul.f32 0.35355338, %v1262_v47  ;;  %v3992_v49 = vpop.f32.mrb[9].mxu1 }
 0x69a   : > { %v1267_v50 = vsel %vm1097_vm9, %v1266_v48, -inf }
 0x69b   : > { %1268 = vmax.xlane.f32.xlu1 %v1267_v50  ;;  %v3702_v50 = vld [vmem:[%s5381_s8] ss:$0 sm:$0xff] }
 0x6ac   : > { %1278 = vrot.lane.b32.xlu1 %v4930_v25, %s4487_s24 }
 0x6b0   : > { %1503 = vrot.lane.b32.xlu1 %v4930_v25, %s5408_s22  ;;  %s5436_s22 = sld [smem:[#allocation16_spill]] }
 0x6b4   : > { %1501 = vrot.lane.b32.xlu1 %v4930_v25, %s5407_s2 }
 0x6b6   : > { %s5331_s2 = scalar_lea.hbm %s5436_s22, %s3769_s21 }
 0x728   : > { %v1269_v51 = vpop.xlane.xlu1 %1268 }
 0x729   : > { %v1270_v52 = vsub.f32 %v1266_v48, %v1269_v51 }
 0x72b   : > { %v1271_v53 = vmul.f32 1.442695, %v1270_v52 }
 0x72c   : > { %v1279_v54 = vpop.permute.xlu1 %1278 }
 0x72d   : > { %4375 = vpow2.f32 %v1271_v53  ;;  %3994 = vmatpush3.msk.msra.mxu0 %vm1115_vm8, %v1279_v54 }
 0x72e   : > { %4003 = vmatprep.subr.mxu0 %v4481_v45 }
 0x730   : > { %v1504_v63 = vpop.permute.xlu1 %1503 }
 0x734   : > { %v1502_v3 = vpop.permute.xlu1 %1501 }
 0x737   : > { %v4376_v55 = vpop.eup %4375 }
 0x738   : > { %v1273_v56 = vsel %vm1097_vm9, %v4376_v55, 0.0 }
 0x739   : > { %1274 = vadd.xlane.f32.xlu0 %v1273_v56 }
 0x74f   : > { %1591 = vrot.lane.b32.xlu0 %v4930_v25, %s5406_s0  ;;  %s5432_s0 = smov 104  }
 0x753   : > { %1744 = vrot.lane.b32.xlu0 %v4930_v25, %s5404_s25 }
 0x7c6   : > { %v1275_v58 = vpop.xlane.xlu0 %1274 }
 0x7c7   : > { %4377 = vrcp.f32 %v1275_v58 }
 0x7ca   : > { %v1592_v62 = vpop.permute.xlu0 %1591 }
 0x7ce   : > { %v1745_v18 = vpop.permute.xlu0 %1744 }
 0x7d1   : > { %v4378_v59 = vpop.eup %4377 }
 0x7d2   : > { %v1277_v60 = vmul.f32 %v4378_v59, %v4376_v55  ;;  %v2021_v59 = vld [vmem:[%s5384_s11] sm:$0xff] }
 0x7d4   : > { %3996 = vmatmul.mubr.msk.f32.vlgmr.msra.gmra.mrb[4].mxu0 %vm1111_vm10, %v1277_v60 }
 0x7d5   : > { %4004 = vmatpush3.msra.mxu0 %v1014_v61  ;;  %4005 = vmatprep.mubr.msk.f32.mxu0 %vm4480_vm0, %v4481_v45  ;;  %v2023_v61 = vld [vmem:[%s5384_s11 + $0x10] sm:$0xff] }
 0x7d6   : > { %4013 = vmatprep.subr.mxu0 %v4481_v45 }
 0x7d8   : > { %4006 = vmatmul.mubr.msk.f32.vlgmr.msra.gmra.mrb[6].mxu0 %vm1021_vm7, %v1184_v44 }
 0x7d9   : > { %4014 = vmatpush3.msk.msra.mxu0 %vm1115_vm8, %v1592_v62  ;;  %4015 = vmatprep.mubr.msk.f32.mxu0 %vm4480_vm0, %v4481_v45  ;;  %v2024_v62 = vld [vmem:[%s5384_s11 + $0x18] sm:$0xff] }
 0x7da   : > { %4023 = vmatprep.subr.mxu0 %v4481_v45 }
 0x8a7   : > { %v1351_v1 = vpop.f32.mrb[4].mxu0 }
 0x8a8   : > { %v3997_v2 = vpop.f32.mrb[5].mxu0  ;;  %4001 = vmatmul.mubr.msk.f32.vlgmr.msra.gmra.mrb[10].mxu1 %vm1021_vm7, %v1351_v1 }
 0x8a9   : > { %4009 = vmatpush3.xpose.msk.msra.mxu1 %vm1021_vm7, %v1504_v63  ;;  %4010 = vmatprep.mubr.msk.f32.mxu1 %vm4480_vm0, %v4481_v45  ;;  %v4270_v63 = vpack.c.bf16 %v2024_v62, %v2023_v61 }
 0x8aa   : > { %4018 = vmatprep.subr.mxu1 %v4481_v45 }
 0x8ab   : > { %v1497_v4 = vpop.f32.mrb[6].mxu0 }
 0x8ac   : > { %v4007_v5 = vpop.f32.mrb[7].mxu0  ;;  %4011 = vmatmul.mubr.msk.f32.vlgmr.msra.gmra.mrb[12].mxu1 %vm1021_vm7, %v1502_v3 }
 0x8ad   : > { %4020 = vmatprep.mubr.msk.f32.mxu1 %vm4480_vm0, %v4481_v45  ;;  %4019 = vmatpush3.msra.mxu1 %v1016_v23  ;;  %v3703_v5 = vld [vmem:[%s5382_s9] ss:$0 sm:$0xff] }
 0x8ae   : > { %4028 = vmatprep.subr.mxu1 %v4481_v45 }
 0x97b   : > { %v1424_v6 = vpop.f32.mrb[10].mxu1 }
 0x97c   : > { %v1498_v7 = vadd.f32 %v1497_v4, %v1424_v6  ;;  %v4002_v8 = vpop.f32.mrb[11].mxu1 }
 0x97f   : > { %v1575_v9 = vpop.f32.mrb[12].mxu1 }
 0x980   : > { %v1579_v10 = vmul.f32 0.35355338, %v1575_v9  ;;  %v4012_v11 = vpop.f32.mrb[13].mxu1 }
 0x981   : > { %v2111_v11 = vld [vmem:[%s5386_s13 + $0x8] sm:$0xff] }
 0x982   : > { %v1580_v12 = vsel %vm1097_vm9, %v1579_v10, -inf }
 0x983   : > { %1581 = vmax.xlane.f32.xlu1 %v1580_v12 }
 0xa10   : > { %v1582_v13 = vpop.xlane.xlu1 %1581 }
 0xa11   : > { %v1583_v14 = vsub.f32 %v1579_v10, %v1582_v13  ;;  %v2110_v10 = vld [vmem:[%s5386_s13] sm:$0xff]  ;;  %v2112_v13 = vld [vmem:[%s5386_s13 + $0x10] sm:$0xff] }
 0xa12   : > { %v4273_v12 = vpack.c.bf16 %v2111_v11, %v2110_v10 }
 0xa13   : > { %v1584_v15 = vmul.f32 1.442695, %v1583_v14  ;;  %v2113_v14 = vld [vmem:[%s5386_s13 + $0x18] sm:$0xff] }
 0xa15   : > { %4379 = vpow2.f32 %v1584_v15  ;;  %v4276_v15 = vpack.c.bf16 %v2113_v14, %v2112_v13 }
 0xa1f   : > { %v4380_v16 = vpop.eup %4379 }
 0xa20   : > { %v1586_v17 = vsel %vm1097_vm9, %v4380_v16, 0.0 }
 0xa21   : > { %1587 = vadd.xlane.f32.xlu0 %v1586_v17  ;;  %v2115_v17 = vld [vmem:[%s5386_s13 + $0x28] sm:$0xff] }
 0xa37   : > { %1742 = vrot.lane.b32.xlu0 %v4930_v25, %s5405_s23  ;;  %s5433_s23 = smov 72  }
 0xaae   : > { %v1588_v19 = vpop.xlane.xlu0 %1587 }
 0xaaf   : > { %4381 = vrcp.f32 %v1588_v19  ;;  %v2116_v19 = vld [vmem:[%s5386_s13 + $0x30] sm:$0xff] }
 0xab2   : > { %v1743_v22 = vpop.permute.xlu0 %1742 }
 0xab9   : > { %v4382_v20 = vpop.eup %4381 }
 0xaba   : > { %v1590_v21 = vmul.f32 %v4382_v20, %v4380_v16  ;;  %v2114_v16 = vld [vmem:[%s5386_s13 + $0x20] sm:$0xff]  ;;  %v2117_v20 = vld [vmem:[%s5386_s13 + $0x38] sm:$0xff] }
 0xabc   : > { %4016 = vmatmul.mubr.msk.f32.vlgmr.msra.gmra.mrb[8].mxu0 %vm1111_vm10, %v1590_v21  ;;  %v4282_v21 = vpack.c.bf16 %v2117_v20, %v2116_v19  ;;  %v3721_v20 = vld [vmem:[%s5380_s7 + $0x28] sm:$0xff] }
 0xabd   : > { %4024 = vmatpush3.xpose.msk.msra.mxu0 %vm1021_vm7, %v1745_v18  ;;  %4025 = vmatprep.mubr.msk.f32.mxu0 %vm4480_vm0, %v4481_v45  ;;  %v4279_v18 = vpack.c.bf16 %v2115_v17, %v2114_v16 }
 0xabe   : > { %4033 = vmatprep.subr.mxu0 %v4481_v45 }
 0xac0   : > { %4026 = vmatmul.mubr.msk.f32.vlgmr.msra.gmra.mrb[10].mxu0 %vm1021_vm7, %v1743_v22  ;;  %v3705_v22 = vld [vmem:[%s5385_s12] ss:$0 sm:$0xff] }
 0xac1   : > { %4035 = vmatprep.mubr.msk.f32.mxu0 %vm4480_vm0, %v4481_v45  ;;  %4034 = vmatpush3.msra.mxu0 %v1017_v37 }
 0xac2   : > { %4272 = vmatprep.subr.bf16.mxu0 %v4479_v38 }
 0xb8f   : > { %v1664_v24 = vpop.f32.mrb[8].mxu0 }
 0xb90   : > { %v4017_v26 = vpop.f32.mrb[9].mxu0  ;;  %4021 = vmatmul.mubr.msk.f32.vlgmr.msra.gmra.mrb[14].mxu1 %vm1021_vm7, %v1664_v24 }
 0xb91   : > { %4030 = vmatprep.mubr.msk.f32.mxu1 %vm4480_vm0, %v4481_v45 }
 0xb93   : > { %v1816_v27 = vpop.f32.mrb[10].mxu0 }
 0xb94   : > { %v1820_v28 = vmul.f32 0.35355338, %v1816_v27  ;;  %v4027_v29 = vpop.f32.mrb[11].mxu0 }
 0xb96   : > { %v1821_v30 = vsel %vm1097_vm9, %v1820_v28, -inf }
 0xb97   : > { %1822 = vmax.xlane.f32.xlu1 %v1821_v30 }
 0xba8   : > { %1832 = vrot.lane.b32.xlu1 %v4930_v25, %s5403_s18  ;;  %s5431_s18 = smov 48  }
 0xc24   : > { %v1823_v31 = vpop.xlane.xlu1 %1822 }
 0xc25   : > { %v1824_v32 = vsub.f32 %v1820_v28, %v1823_v31 }
 0xc27   : > { %v1825_v33 = vmul.f32 1.442695, %v1824_v32  ;;  %v3707_v32 = vld [vmem:[%s5387_s14] ss:$0 sm:$0xff] }
 0xc28   : > { %v1833_v34 = vpop.permute.xlu1 %1832 }
 0xc29   : > { %4383 = vpow2.f32 %v1825_v33  ;;  %4029 = vmatpush3.msk.msra.mxu1 %vm1115_vm8, %v1833_v34 }
 0xc2a   : > { %4266 = vmatprep.subr.bf16.mxu1 %v4479_v38 }
 0xc33   : > { %v4384_v35 = vpop.eup %4383 }
 0xc34   : > { %v1827_v36 = vsel %vm1097_vm9, %v4384_v35, 0.0 }
 0xc35   : > { %1828 = vadd.xlane.f32.xlu0 %v1827_v36 }
 0xc63   : > { %v1737_v25 = vpop.f32.mrb[14].mxu1 }
 0xc64   : > { %v1741_v39 = vadd.f32 %v1737_v25, %v1498_v7  ;;  %v4022_v40 = vpop.f32.mrb[15].mxu1  ;;  %v3704_v7 = vld [vmem:[%s5383_s10] ss:$0 sm:$0xff] }
 0xcc2   : > { %v1829_v41 = vpop.xlane.xlu0 %1828 }
 0xcc3   : > { %4385 = vrcp.f32 %v1829_v41 }
 0xccd   : > { %v4386_v42 = vpop.eup %4385 }
 0xcce   : > { %v1831_v43 = vmul.f32 %v4386_v42, %v4384_v35 }
 0xcd0   : > { %4031 = vmatmul.mubr.msk.f32.vlgmr.msra.gmra.mrb[16].mxu1 %vm1111_vm10, %v1831_v43  ;;  %v3713_v43 = vld [vmem:[%s5378_s5 + $0x20] sm:$0xff] }
 0xcd1   : > { %4046 = vmatprep.mubr.msk.f32.mxu1 %vm4480_vm0, %v4481_v45 }
 0xda3   : > { %v1905_v44 = vpop.f32.mrb[16].mxu1 }
 0xda4   : > { %v4032_v46 = vpop.f32.mrb[17].mxu1  ;;  %4036 = vmatmul.mubr.msk.f32.vlgmr.msra.gmra.mrb[12].mxu0 %vm1021_vm7, %v1905_v44  ;;  %v3714_v44 = vld [vmem:[%s5378_s5 + $0x28] sm:$0xff] }
 0xda5   : > { %4065 = vmatprep.mubr.msk.f32.mxu0 %vm4480_vm0, %v4481_v45  ;;  %4274 = vmatpush3.bf16.msra.mxu0 %v4273_v12  ;;  %v4285_v46 = vpack.c.bf16 %v3714_v44, %v3713_v43 }
 0xda6   : > { %4275 = vmatprep.subr.bf16.mxu0 %v4479_v38 }
 0xda9   : > { %4277 = vmatpush3.bf16.msra.mxu0 %v4276_v15 }
 0xdaa   : > { %4278 = vmatprep.subr.bf16.mxu0 %v4479_v38 }
 0xdad   : > { %4280 = vmatpush3.bf16.msra.mxu0 %v4279_v18 }
 0xdae   : > { %4281 = vmatprep.subr.bf16.mxu0 %v4479_v38 }
 0xdb1   : > { %4283 = vmatpush3.bf16.msra.mxu0 %v4282_v21 }
 0xdb2   : > { %4084 = vmatprep.subr.mxu0 %v4481_v45 }
 0xe77   : > { %v1978_v47 = vpop.f32.mrb[12].mxu0 }
 0xe78   : > { %v1982_v48 = vadd.f32 %v1978_v47, %v1741_v39  ;;  %v4037_v49 = vpop.f32.mrb[13].mxu0  ;;  %v3715_v47 = vld [vmem:[%s5378_s5 + $0x30] sm:$0xff] }
 0xe7a   : > { %v1983_v51 = vadd.f32 %v1982_v48, %v4898_v0  ;;  %v2022_v0 = vld [vmem:[%s5384_s11 + $0x8] sm:$0xff]  ;;  %v3716_v48 = vld [vmem:[%s5378_s5 + $0x38] sm:$0xff] }
 0xe7b   : > { %v4267_v60 = vpack.c.bf16 %v2022_v0, %v2021_v59  ;;  %v4288_v49 = vpack.c.bf16 %v3716_v48, %v3715_v47  ;;  %v3718_v59 = vld [vmem:[%s5379_s6 + $0x1] ss:$0 sm:$0xff] }
 0xe7c   : > { %v5035_v52 = vadd.f32 %v3702_v50, %v1983_v51 }
 0xe7d   : > { %4268 = vmatpush3.bf16.msra.mxu1 %v4267_v60 }
 0xe7e   : > { %v1994_v53 = vsel %vm900_vm5, %v5035_v52, 0.0  ;;  %4269 = vmatprep.subr.bf16.mxu1 %v4479_v38 }
 0xe7f   : > { %1995 = vadd.xlane.f32.xlu1 %v1994_v53 }
 0xe81   : > { %4271 = vmatpush3.bf16.msra.mxu1 %v4270_v63 }
 0xe82   : > { %4284 = vmatprep.subr.bf16.mxu1 %v4479_v38 }
 0xf0c   : > { %v1996_v54 = vpop.xlane.xlu1 %1995 }
 0xf0d   : > { %v1997_v55 = vmul.f32 0.03125, %v1996_v54  ;;  %v3711_v54 = vld [vmem:[%s5427_s26 + $0x1] ss:$0 sm:$0xff] }
 0xf0f   : > { %v1998_v56 = vsub.f32 %v5035_v52, %v1997_v55 }
 0xf11   : > { %v1999_v57 = vmul.f32 %v1998_v56, %v1998_v56 }
 0xf13   : > { %v2000_v58 = vsel %vm900_vm5, %v1999_v57, 0.0 }
 0xf14   : > { %2001 = vadd.xlane.f32.xlu0 %v2000_v58 }
 0xfa1   : > { %v2002_v1 = vpop.xlane.xlu0 %2001 }
 0xfa2   : > { %v2003_v2 = vmul.f32 0.03125, %v2002_v1 }
 0xfa4   : > { %v2004_v3 = vadd.f32 1e-06, %v2003_v2 }
 0xfa6   : > { %4387 = vrsqrt.f32 %v2004_v3 }
 0xfb0   : > { %v4388_v4 = vpop.eup %4387 }
 0xfb1   : > { %v2006_v6 = vmul.f32 %v4388_v4, %v1998_v56  ;;  %v3712_v56 = vld [vmem:[%s5377_s4 + $0x1] ss:$0 sm:$0xff] }
 0xfb3   : > { %v2013_v8 = vmul.f32 %v3703_v5, %v2006_v6 }
 0xfb5   : > { %v2020_v9 = vadd.f32 %v3704_v7, %v2013_v8 }
 0xfb7   : > { %4047 = vmatmul.mubr.msk.f32.vlgmr.msra.gmra.mrb[18].mxu1 %vm940_vm6, %v2020_v9 }
 0xfb8   : > { %4076 = vmatprep.mubr.msk.f32.mxu1 %vm4480_vm0, %v4481_v45  ;;  %4286 = vmatpush3.bf16.msra.mxu1 %v4285_v46 }
 0xfb9   : > { %4287 = vmatprep.subr.bf16.mxu1 %v4479_v38 }
 0xfbc   : > { %4289 = vmatpush3.bf16.msra.mxu1 %v4288_v49 }
 0xfbd   : > { %4079 = vmatprep.subr.mxu1 %v4481_v45 }
0x108a   : > { %v2101_v23 = vpop.f32.mrb[18].mxu1 }
0x108b   : > { %v2102_v24 = vadd.f32 %v3705_v22, %v2101_v23  ;;  %v4048_v26 = vpop.f32.mrb[19].mxu1 }
0x108d   : > { %v2106_v27 = vmul.f32 0.70710677, %v2102_v24  ;;  %v2105_v29 = vmul.f32 0.5, %v2102_v24 }
0x108f   : > { %4389 = verf.f32 %v2106_v27 }
0x1099   : > { %v4390_v28 = vpop.eup %4389 }
0x109a   : > { %v2108_v30 = vadd.f32 1.0, %v4390_v28 }
0x109c   : > { %v2109_v31 = vmul.f32 %v2108_v30, %v2105_v29  ;;  %v3720_v30 = vld [vmem:[%s5380_s7 + $0x20] sm:$0xff] }
0x109e   : > { %4066 = vmatmul.mubr.msk.f32.vlgmr.msra.gmra.mrb[14].mxu0 %vm2125_vm11, %v2109_v31 }
0x109f   : > { %4086 = vmatprep.mubr.msk.f32.mxu0 %vm4480_vm0, %v4481_v45 }
0x1171   : > { %v2195_v33 = vpop.f32.mrb[14].mxu0 }
0x1172   : > { %v2196_v34 = vadd.f32 %v3707_v32, %v2195_v33  ;;  %v4067_v35 = vpop.f32.mrb[15].mxu0 }
0x1174   : > { %v5102_v36 = vadd.f32 %v2196_v34, %v5035_v52 }
0x1176   : > { %v2204_v37 = vsel %vm900_vm5, %v5102_v36, 0.0 }
0x1177   : > { %2205 = vadd.xlane.f32.xlu0 %v2204_v37 }
0x1204   : > { %v2206_v25 = vpop.xlane.xlu0 %2205 }
0x1205   : > { %v2207_v39 = vmul.f32 0.03125, %v2206_v25 }
0x1207   : > { %v2208_v40 = vsub.f32 %v5102_v36, %v2207_v39 }
0x1209   : > { %v2209_v41 = vmul.f32 %v2208_v40, %v2208_v40 }
0x120b   : > { %v2210_v42 = vsel %vm900_vm5, %v2209_v41, 0.0 }
0x120c   : > { %2211 = vadd.xlane.f32.xlu0 %v2210_v42 }
0x1299   : > { %v2212_v50 = vpop.xlane.xlu0 %2211 }
0x129a   : > { %v2213_v51 = vmul.f32 0.03125, %v2212_v50 }
0x129c   : > { %v2214_v52 = vadd.f32 1e-06, %v2213_v51 }
0x129e   : > { %4391 = vrsqrt.f32 %v2214_v52 }
0x12a8   : > { %v4392_v53 = vpop.eup %4391 }
0x12a9   : > { %v2216_v55 = vmul.f32 %v4392_v53, %v2208_v40 }
0x12ab   : > { %v2223_v57 = vmul.f32 %v3711_v54, %v2216_v55 }
0x12ad   : > { %v2230_v58 = vadd.f32 %v3712_v56, %v2223_v57 }
0x12af   : > { %4077 = vmatmul.mubr.msk.f32.vlgmr.msra.gmra.mrb[20].mxu1 %vm940_vm6, %v2230_v58 }
0x12b0   : > { %4081 = vmatprep.mubr.msk.f32.mxu1 %vm4480_vm0, %v4481_v45 }
0x1382   : > { %v2313_v0 = vpop.f32.mrb[20].mxu1 }
0x1383   : > { %v5134_v60 = vadd.f32 %v3718_v59, %v2313_v0  ;;  %v4078_v61 = vpop.f32.mrb[21].mxu1  ;;  %v3722_v59 = vld [vmem:[%s5380_s7 + $0x30] sm:$0xff] }
0x1385   : > { %2490 = vrot.lane.b32.xlu1 %v5134_v60, %s4485_s20  ;;  %2323 = vrot.lane.b32.xlu0 %v5134_v60, %s4484_s27  ;;  %s5428_s27 = smov 80   ;;  %s5429_s20 = smov 112  }
0x1389   : > { %2488 = vrot.lane.b32.xlu0 %v5134_v60, %s4486_s19  ;;  %s5430_s19 = smov 64  }
0x13f7   : > { %v2324_v62 = vpop.permute.xlu0 %2323  ;;  %v2491_v63 = vpop.permute.xlu1 %2490 }
0x13f8   : > { %4080 = vmatpush3.xpose.msk.msra.mxu1 %vm1021_vm7, %v2324_v62 }
0x13f9   : > { %4089 = vmatprep.subr.mxu1 %v4481_v45 }
0x13fb   : > { %4082 = vmatmul.mubr.msk.f32.vlgmr.msra.gmra.mrb[22].mxu1 %vm1021_vm7, %v5134_v60  ;;  %v2489_v1 = vpop.permute.xlu0 %2488 }
0x13fc   : > { %4090 = vmatpush3.xpose.msk.msra.mxu1 %vm1021_vm7, %v2491_v63  ;;  %4091 = vmatprep.mubr.msk.f32.mxu1 %vm4480_vm0, %v4481_v45 }
0x13fd   : > { %4099 = vmatprep.subr.mxu1 %v4481_v45 }
0x13ff   : > { %4092 = vmatmul.mubr.msk.f32.vlgmr.msra.gmra.mrb[24].mxu1 %vm1021_vm7, %v2489_v1 }
0x1400   : > { %4101 = vmatprep.mubr.msk.f32.mxu1 %vm4480_vm0, %v4481_v45  ;;  %4100 = vmatpush3.msra.mxu1 %v3721_v20  ;;  %v3745_v20 = vld [vmem:[%s5381_s8 + $0x1] ss:$0 sm:$0xff] }
0x1401   : > { %4109 = vmatprep.subr.mxu1 %v4481_v45 }
0x14ce   : > { %v2395_v2 = vpop.f32.mrb[22].mxu1 }
0x14cf   : > { %v2399_v3 = vmul.f32 0.35355338, %v2395_v2  ;;  %v4083_v4 = vpop.f32.mrb[23].mxu1 }
0x14d1   : > { %v2400_v5 = vsel %vm1097_vm9, %v2399_v3, -inf }
0x14d2   : > { %2401 = vmax.xlane.f32.xlu0 %v2400_v5  ;;  %v2562_v6 = vpop.f32.mrb[24].mxu1 }
0x14d3   : > { %v2566_v7 = vmul.f32 0.35355338, %v2562_v6  ;;  %v4093_v8 = vpop.f32.mrb[25].mxu1 }
0x14d4   : > { %v3723_v8 = vld [vmem:[%s5380_s7 + $0x38] sm:$0xff] }
0x14d5   : > { %v2567_v9 = vsel %vm1097_vm9, %v2566_v7, -inf }
0x14d6   : > { %2568 = vmax.xlane.f32.xlu1 %v2567_v9 }
0x14e7   : > { %2578 = vrot.lane.b32.xlu1 %v5134_v60, %s4487_s24  ;;  %s4419_s24 = sshll.u32 %s4494_s1, 4  ;;  %s4420_s24 = int_to_ptr.vmem [resolvable:$false] %s4419_s24 }
0x14eb   : > { %2803 = vrot.lane.b32.xlu1 %v5134_v60, %s5428_s27  ;;  %s5434_s27 = smov 40  }
0x14ef   : > { %2801 = vrot.lane.b32.xlu1 %v5134_v60, %s5429_s20  ;;  %s593_s20 = sand.u32 1, %s4469_s30  }
0x14f0   : > { %s594_s25 = scalar_lea.vmem [#allocation2], %s593_s20 }
0x155f   : > { %v2402_v10 = vpop.xlane.xlu0 %2401 }
0x1560   : > { %v2403_v11 = vsub.f32 %v2399_v3, %v2402_v10 }
0x1562   : > { %v2404_v12 = vmul.f32 1.442695, %v2403_v11 }
0x1563   : > { %v2569_v13 = vpop.xlane.xlu1 %2568 }
0x1564   : > { %4393 = vpow2.f32 %v2404_v12  ;;  %v2570_v14 = vsub.f32 %v2566_v7, %v2569_v13 }
0x1566   : > { %v2571_v15 = vmul.f32 1.442695, %v2570_v14 }
0x1567   : > { %v2579_v27 = vpop.permute.xlu1 %2578 }
0x1568   : > { %4395 = vpow2.f32 %v2571_v15 }
0x156b   : > { %v2804_v33 = vpop.permute.xlu1 %2803 }
0x156e   : > { %v4394_v16 = vpop.eup %4393 }
0x156f   : > { %v2406_v17 = vsel %vm1097_vm9, %v4394_v16, 0.0  ;;  %v2802_v37 = vpop.permute.xlu1 %2801 }
0x1570   : > { %2407 = vadd.xlane.f32.xlu0 %v2406_v17 }
0x1572   : > { %v4396_v18 = vpop.eup %4395 }
0x1573   : > { %v2573_v19 = vsel %vm1097_vm9, %v4396_v18, 0.0 }
0x1574   : > { %2574 = vadd.xlane.f32.xlu0 %v2573_v19 }
0x158a   : > { %2411 = vrot.lane.b32.xlu0 %v5134_v60, %s5430_s19 }
0x15fd   : > { %v2408_v21 = vpop.xlane.xlu0 %2407 }
0x15fe   : > { %4397 = vrcp.f32 %v2408_v21 }
0x1601   : > { %v2575_v22 = vpop.xlane.xlu0 %2574 }
0x1602   : > { %4399 = vrcp.f32 %v2575_v22 }
0x1605   : > { %v2412_v23 = vpop.permute.xlu0 %2411 }
0x1606   : > { %4085 = vmatpush3.msk.msra.mxu0 %vm1115_vm8, %v2412_v23 }
0x1607   : > { %4094 = vmatprep.subr.mxu0 %v4481_v45 }
0x1608   : > { %v4398_v24 = vpop.eup %4397 }
0x1609   : > { %v2410_v26 = vmul.f32 %v4398_v24, %v4394_v16 }
0x160b   : > { %4087 = vmatmul.mubr.msk.f32.vlgmr.msra.gmra.mrb[16].mxu0 %vm1111_vm10, %v2410_v26 }
0x160c   : > { %v4400_v28 = vpop.eup %4399  ;;  %4095 = vmatpush3.msk.msra.mxu0 %vm1115_vm8, %v2579_v27  ;;  %4096 = vmatprep.mubr.msk.f32.mxu0 %vm4480_vm0, %v4481_v45 }
0x160d   : > { %v2577_v29 = vmul.f32 %v4400_v28, %v4396_v18  ;;  %4104 = vmatprep.subr.mxu0 %v4481_v45 }
0x160f   : > { %4097 = vmatmul.mubr.msk.f32.vlgmr.msra.gmra.mrb[18].mxu0 %vm1111_vm10, %v2577_v29 }
0x1610   : > { %4106 = vmatprep.mubr.msk.f32.mxu0 %vm4480_vm0, %v4481_v45  ;;  %4105 = vmatpush3.msra.mxu0 %v3720_v30  ;;  %v3750_v30 = vld [vmem:[%s5384_s11 + $0x20] sm:$0xff] }
0x1611   : > { %4114 = vmatprep.subr.mxu0 %v4481_v45 }
0x16de   : > { %v2484_v31 = vpop.f32.mrb[16].mxu0 }
0x16df   : > { %v4088_v32 = vpop.f32.mrb[17].mxu0  ;;  %4107 = vmatmul.mubr.msk.f32.vlgmr.msra.gmra.mrb[20].mxu0 %vm1021_vm7, %v2484_v31 }
0x16e0   : > { %4116 = vmatprep.mubr.msk.f32.mxu0 %vm4480_vm0, %v4481_v45  ;;  %v3752_v32 = vld [vmem:[%s5384_s11 + $0x30] sm:$0xff] }
0x16e2   : > { %v2651_v34 = vpop.f32.mrb[18].mxu0 }
0x16e3   : > { %v4098_v35 = vpop.f32.mrb[19].mxu0  ;;  %4102 = vmatmul.mubr.msk.f32.vlgmr.msra.gmra.mrb[26].mxu1 %vm1021_vm7, %v2651_v34 }
0x16e4   : > { %4110 = vmatpush3.xpose.msk.msra.mxu1 %vm1021_vm7, %v2804_v33  ;;  %4111 = vmatprep.mubr.msk.f32.mxu1 %vm4480_vm0, %v4481_v45  ;;  %v3753_v33 = vld [vmem:[%s5384_s11 + $0x38] sm:$0xff] }
0x16e5   : > { %4119 = vmatprep.subr.mxu1 %v4481_v45  ;;  %v4294_v34 = vpack.c.bf16 %v3753_v33, %v3752_v32 }
0x16e7   : > { %4112 = vmatmul.mubr.msk.f32.vlgmr.msra.gmra.mrb[28].mxu1 %vm1021_vm7, %v2802_v37 }
0x16e8   : > { %4121 = vmatprep.mubr.msk.f32.mxu1 %vm4480_vm0, %v4481_v45  ;;  %4120 = vmatpush3.msra.mxu1 %v3722_v59 }
0x16e9   : > { %4129 = vmatprep.subr.mxu1 %v4481_v45 }
0x17b2   : > { %v2797_v25 = vpop.f32.mrb[20].mxu0 }
0x17b3   : > { %v4108_v39 = vpop.f32.mrb[21].mxu0 }
0x17b6   : > { %v2724_v40 = vpop.f32.mrb[26].mxu1 }
0x17b7   : > { %v2798_v41 = vadd.f32 %v2797_v25, %v2724_v40  ;;  %v4103_v42 = vpop.f32.mrb[27].mxu1  ;;  %v3748_v40 = vld [vmem:[%s5382_s9 + $0x1] ss:$0 sm:$0xff] }
0x17b8   : > { %v3749_v42 = vld [vmem:[%s5383_s10 + $0x1] ss:$0 sm:$0xff] }
0x17ba   : > { %v2875_v43 = vpop.f32.mrb[28].mxu1 }
0x17bb   : > { %v2879_v44 = vmul.f32 0.35355338, %v2875_v43  ;;  %v4113_v46 = vpop.f32.mrb[29].mxu1 }
0x17bc   : > { %v3757_v46 = vld [vmem:[%s5386_s13 + $0x40] sm:$0xff] }
0x17bd   : > { %v2880_v47 = vsel %vm1097_vm9, %v2879_v44, -inf }
0x17be   : > { %2881 = vmax.xlane.f32.xlu0 %v2880_v47  ;;  %v3758_v47 = vld [vmem:[%s5386_s13 + $0x48] sm:$0xff] }
0x17d4   : > { %2891 = vrot.lane.b32.xlu0 %v5134_v60, %s5431_s18  ;;  %s3616_s18 = sshll.u32 %s594_s25, 4  ;;  %s5333_s18 = int_to_ptr.vmem [resolvable:$true] %s3616_s18 }
0x17d5   : > { %s4415_s19 = scalar_lea.vmem %s5333_s18, 16  ;;  %p4422_p0 = scmp.lt.s32.totalorder %s5333_s18, %s4420_s24 }
0x17d6   : > { %p4416_p11 = scmp.ne.s32.totalorder %s5333_s18, %s4415_s19 }
0x17d8   : > { %3042 = vrot.lane.b32.xlu0 %v5134_v60, %s5432_s0  ;;  %p4417_p12 = pnand %p4416_p11, %p4633_p5 }
0x17da   : > { %p4418_p13 = pneg %p4417_p12 }
0x184b   : > { %v2882_v48 = vpop.xlane.xlu0 %2881 }
0x184c   : > { %v2883_v49 = vsub.f32 %v2879_v44, %v2882_v48  ;;  %v4297_v48 = vpack.c.bf16 %v3758_v47, %v3757_v46 }
0x184e   : > { %v2884_v50 = vmul.f32 1.442695, %v2883_v49  ;;  %v3759_v49 = vld [vmem:[%s5386_s13 + $0x50] sm:$0xff] }
0x184f   : > { %v2892_v51 = vpop.permute.xlu0 %2891 }
0x1850   : > { %4401 = vpow2.f32 %v2884_v50  ;;  %4115 = vmatpush3.msk.msra.mxu0 %vm1115_vm8, %v2892_v51  ;;  %v3761_v51 = vld [vmem:[%s5386_s13 + $0x60] sm:$0xff] }
0x1851   : > { %4124 = vmatprep.subr.mxu0 %v4481_v45 }
0x1853   : > { %v3043_v58 = vpop.permute.xlu0 %3042 }
0x185a   : > { %v4402_v52 = vpop.eup %4401 }
0x185b   : > { %v2886_v53 = vsel %vm1097_vm9, %v4402_v52, 0.0 }
0x185c   : > { %2887 = vadd.xlane.f32.xlu1 %v2886_v53 }
0x186d   : > { %3044 = vrot.lane.b32.xlu1 %v5134_v60, %s5433_s23 }
0x18e9   : > { %v2888_v54 = vpop.xlane.xlu1 %2887 }
0x18ea   : > { %4403 = vrcp.f32 %v2888_v54  ;;  %v3763_v54 = vld [vmem:[%s5386_s13 + $0x70] sm:$0xff] }
0x18ed   : > { %v3045_v57 = vpop.permute.xlu1 %3044 }
0x18f4   : > { %v4404_v55 = vpop.eup %4403 }
0x18f5   : > { %v2890_v56 = vmul.f32 %v4404_v55, %v4402_v52  ;;  %v3762_v52 = vld [vmem:[%s5386_s13 + $0x68] sm:$0xff]  ;;  %v3764_v55 = vld [vmem:[%s5386_s13 + $0x78] sm:$0xff] }
0x18f6   : > { %v4303_v53 = vpack.c.bf16 %v3762_v52, %v3761_v51 }
0x18f7   : > { %4117 = vmatmul.mubr.msk.f32.vlgmr.msra.gmra.mrb[22].mxu0 %vm1111_vm10, %v2890_v56  ;;  %v4306_v56 = vpack.c.bf16 %v3764_v55, %v3763_v54 }
0x18f8   : > { %4125 = vmatpush3.xpose.msk.msra.mxu0 %vm1021_vm7, %v3045_v57  ;;  %4126 = vmatprep.mubr.msk.f32.mxu0 %vm4480_vm0, %v4481_v45  ;;  %v3755_v57 = vld [vmem:[%s5385_s12 + $0x1] ss:$0 sm:$0xff] }
0x18f9   : > { %4134 = vmatprep.subr.mxu0 %v4481_v45 }
0x18fb   : > { %4127 = vmatmul.mubr.msk.f32.vlgmr.msra.gmra.mrb[24].mxu0 %vm1021_vm7, %v3043_v58 }
0x18fc   : > { %4136 = vmatprep.mubr.msk.f32.mxu0 %vm4480_vm0, %v4481_v45  ;;  %4135 = vmatpush3.msra.mxu0 %v3723_v8 }
0x18fd   : > { %4296 = vmatprep.subr.bf16.mxu0 %v4479_v38 }
0x19ca   : > { %v2964_v0 = vpop.f32.mrb[22].mxu0 }
0x19cb   : > { %v4118_v61 = vpop.f32.mrb[23].mxu0  ;;  %4122 = vmatmul.mubr.msk.f32.vlgmr.msra.gmra.mrb[30].mxu1 %vm1021_vm7, %v2964_v0 }
0x19cc   : > { %4131 = vmatprep.mubr.msk.f32.mxu1 %vm4480_vm0, %v4481_v45 }
0x19ce   : > { %v3116_v62 = vpop.f32.mrb[24].mxu0 }
0x19cf   : > { %v3120_v63 = vmul.f32 0.35355338, %v3116_v62  ;;  %v4128_v1 = vpop.f32.mrb[25].mxu0 }
0x19d1   : > { %v3121_v2 = vsel %vm1097_vm9, %v3120_v63, -inf }
0x19d2   : > { %3122 = vmax.xlane.f32.xlu1 %v3121_v2 }
0x1a5f   : > { %v3123_v3 = vpop.xlane.xlu1 %3122 }
0x1a60   : > { %v3124_v4 = vsub.f32 %v3120_v63, %v3123_v3  ;;  %v3766_v3 = vld [vmem:[%s5387_s14 + $0x1] ss:$0 sm:$0xff] }
0x1a62   : > { %v3125_v5 = vmul.f32 1.442695, %v3124_v4 }
0x1a64   : > { %4405 = vpow2.f32 %v3125_v5 }
0x1a6e   : > { %v4406_v6 = vpop.eup %4405 }
0x1a6f   : > { %v3127_v7 = vsel %vm1097_vm9, %v4406_v6, 0.0 }
0x1a70   : > { %3128 = vadd.xlane.f32.xlu0 %v3127_v7 }
0x1a86   : > { %3132 = vrot.lane.b32.xlu0 %v5134_v60, %s5434_s27  ;;  %s3604_s27 = scalar_lea.sflag [#allocation3], %s593_s20 }
0x1a9e   : > { %v3037_v9 = vpop.f32.mrb[30].mxu1 }
0x1a9f   : > { %v3041_v10 = vadd.f32 %v3037_v9, %v2798_v41  ;;  %v4123_v11 = vpop.f32.mrb[31].mxu1 }
0x1afd   : > { %v3129_v12 = vpop.xlane.xlu0 %3128 }
0x1afe   : > { %4407 = vrcp.f32 %v3129_v12 }
0x1b01   : > { %v3133_v13 = vpop.permute.xlu0 %3132 }
0x1b02   : > { %4130 = vmatpush3.msk.msra.mxu1 %vm1115_vm8, %v3133_v13 }
0x1b03   : > { %4290 = vmatprep.subr.bf16.mxu1 %v4479_v38 }
0x1b08   : > { %v4408_v14 = vpop.eup %4407 }
0x1b09   : > { %v3131_v15 = vmul.f32 %v4408_v14, %v4406_v6  ;;  %v3524_v14 = vld [vmem:[%s5390_s17] sm:$0xff] }
0x1b0b   : > { %4132 = vmatmul.mubr.msk.f32.vlgmr.msra.gmra.mrb[32].mxu1 %vm1111_vm10, %v3131_v15  ;;  %v3525_v15 = vld [vmem:[%s5390_s17 + $0x8] sm:$0xff] }
0x1b0c   : > { %4147 = vmatprep.mubr.msk.f32.mxu1 %vm4480_vm0, %v4481_v45 }
0x1bde   : > { %v3205_v60 = vpop.f32.mrb[32].mxu1 }
0x1bdf   : > { %v4133_v16 = vpop.f32.mrb[33].mxu1  ;;  %4137 = vmatmul.mubr.msk.f32.vlgmr.msra.gmra.mrb[26].mxu0 %vm1021_vm7, %v3205_v60  ;;  %v4309_v60 = vpack.c.bf16 %v3525_v15, %v3524_v14 }
0x1be0   : > { %4166 = vmatprep.mubr.msk.f32.mxu0 %vm4480_vm0, %v4481_v45  ;;  %4298 = vmatpush3.bf16.msra.mxu0 %v4297_v48  ;;  %v3526_v16 = vld [vmem:[%s5390_s17 + $0x10] sm:$0xff] }
0x1be1   : > { %4299 = vmatprep.subr.bf16.mxu0 %v4479_v38 }
0x1cb2   : > { %v3278_v17 = vpop.f32.mrb[26].mxu0 }
0x1cb3   : > { %v3282_v18 = vadd.f32 %v3278_v17, %v3041_v10  ;;  %v4138_v19 = vpop.f32.mrb[27].mxu0  ;;  %v3527_v17 = vld [vmem:[%s5390_s17 + $0x18] sm:$0xff] }
0x1cb5   : > { %v3283_v21 = vadd.f32 %v3282_v18, %v5102_v36  ;;  %v3751_v36 = vld [vmem:[%s5384_s11 + $0x28] sm:$0xff]  ;;  %v4312_v18 = vpack.c.bf16 %v3527_v17, %v3526_v16 }
0x1cb6   : > { %v4291_v31 = vpack.c.bf16 %v3751_v36, %v3750_v30 }
0x1cb7   : > { %v5239_v22 = vadd.f32 %v3745_v20, %v3283_v21 }
0x1cb8   : > { %4292 = vmatpush3.bf16.msra.mxu1 %v4291_v31 }
0x1cb9   : > { %v3297_v23 = vsel %vm900_vm5, %v5239_v22, 0.0  ;;  %4293 = vmatprep.subr.bf16.mxu1 %v4479_v38 }
0x1cba   : > { %3298 = vadd.xlane.f32.xlu1 %v3297_v23 }
0x1cbc   : > { %4295 = vmatpush3.bf16.msra.mxu1 %v4294_v34 }
0x1cbd   : > { %4308 = vmatprep.subr.bf16.mxu1 %v4479_v38 }
0x1d47   : > { %v3299_v24 = vpop.xlane.xlu1 %3298 }
0x1d48   : > { %v3300_v26 = vmul.f32 0.03125, %v3299_v24  ;;  %v3507_v24 = vld [vmem:[%s5389_s16] sm:$0x1] }
0x1d4a   : > { %v3301_v27 = vsub.f32 %v5239_v22, %v3300_v26 }
0x1d4c   : > { %v3302_v28 = vmul.f32 %v3301_v27, %v3301_v27 }
0x1d4e   : > { %v3303_v29 = vsel %vm900_vm5, %v3302_v28, 0.0  ;;  %v3528_v28 = vld [vmem:[%s5435_s28] sm:$0x1]  ;;  %s4421_s28 = scalar_lea.vmem %s4420_s24, 32 }
0x1d4f   : > { %3304 = vadd.xlane.f32.xlu1 %v3303_v29  ;;  %p4423_p1 = scmp.lt.s32.totalorder %s4421_s28, %s4415_s19 }
0x1d51   : > { %p4424_p2 = por %p4423_p1, %p4422_p0 }
0x1d53   : > { %p4425_p3 = pnand %p4424_p2, %p4418_p13 }
0x1ddc   : > { %v3305_v35 = vpop.xlane.xlu1 %3304 }
0x1ddd   : > { %v3306_v37 = vmul.f32 0.03125, %v3305_v35 }
0x1ddf   : > { %v3307_v25 = vadd.f32 1e-06, %v3306_v37 }
0x1de1   : > { %4409 = vrsqrt.f32 %v3307_v25 }
0x1deb   : > { %v4410_v39 = vpop.eup %4409 }
0x1dec   : > { %v3309_v41 = vmul.f32 %v4410_v39, %v3301_v27 }
0x1dee   : > { %v3316_v43 = vmul.f32 %v3748_v40, %v3309_v41 }
0x1df0   : > { %v3323_v44 = vadd.f32 %v3749_v42, %v3316_v43 }
0x1df2   : > { %4148 = vmatmul.mubr.msk.f32.vlgmr.msra.gmra.mrb[34].mxu1 %vm940_vm6, %v3323_v44 }
0x1df3   : > { %4177 = vmatprep.mubr.msk.f32.mxu1 %vm4480_vm0, %v4481_v45  ;;  %v3760_v45 = vld [vmem:[%s5386_s13 + $0x58] sm:$0xff]  ;;  %4310 = vmatpush3.bf16.msra.mxu1 %v4309_v60 }
0x1df4   : > { %v4300_v50 = vpack.c.bf16 %v3760_v45, %v3759_v49  ;;  %4311 = vmatprep.subr.bf16.mxu1 %v4479_v38 }
0x1df6   : > { %4301 = vmatpush3.bf16.msra.mxu0 %v4300_v50 }
0x1df7   : > { %4302 = vmatprep.subr.bf16.mxu0 %v4479_v38  ;;  %4313 = vmatpush3.bf16.msra.mxu1 %v4312_v18 }
0x1dfa   : > { %4304 = vmatpush3.bf16.msra.mxu0 %v4303_v53 }
0x1dfb   : > { %4305 = vmatprep.subr.bf16.mxu0 %v4479_v38  ;;  %v3506_v38 = vld [vmem:[%s5388_s15] sm:$0x1] }
0x1dfe   : > { %4307 = vmatpush3.bf16.msra.mxu0 %v4306_v56 }
0x1ec5   : > { %v3406_v58 = vpop.f32.mrb[34].mxu1 }
0x1ec6   : > { %v3407_v59 = vadd.f32 %v3755_v57, %v3406_v58  ;;  %v4149_v0 = vpop.f32.mrb[35].mxu1 }
0x1ec8   : > { %v3411_v61 = vmul.f32 0.70710677, %v3407_v59  ;;  %v3410_v63 = vmul.f32 0.5, %v3407_v59 }
0x1eca   : > { %4411 = verf.f32 %v3411_v61 }
0x1ed4   : > { %v4412_v62 = vpop.eup %4411 }
0x1ed5   : > { %v3413_v1 = vadd.f32 1.0, %v4412_v62 }
0x1ed7   : > { %v3414_v2 = vmul.f32 %v3413_v1, %v3410_v63 }
0x1ed9   : > { %4167 = vmatmul.mubr.msk.f32.vlgmr.msra.gmra.mrb[28].mxu0 %vm2125_vm11, %v3414_v2 }
0x1fac   : > { %v3501_v4 = vpop.f32.mrb[28].mxu0 }
0x1fad   : > { %v3502_v5 = vadd.f32 %v3766_v3, %v3501_v4  ;;  %v4168_v6 = vpop.f32.mrb[29].mxu0 }
0x1faf   : > { %v3505_v7 = vadd.f32 %v3502_v5, %v5239_v22 }
0x1fb1   : > { %v3509_v8 = vsel %vm3508_vm12, %v3505_v7, 0.0 }
0x1fb2   : > { %3510 = vadd.xlane.f32.xlu1 %v3509_v8 }
0x203f   : > { %v3511_v9 = vpop.xlane.xlu1 %3510 }
0x2040   : > { %v3512_v10 = vmul.f32 0.03125, %v3511_v9 }
0x2042   : > { %v3513_v11 = vsub.f32 %v3505_v7, %v3512_v10 }
0x2044   : > { %v3514_v12 = vmul.f32 %v3513_v11, %v3513_v11 }
0x2046   : > { %v3515_v13 = vsel %vm3508_vm12, %v3514_v12, 0.0 }
0x2047   : > { %3516 = vadd.xlane.f32.xlu1 %v3515_v13 }
0x20d4   : > { %v3517_v19 = vpop.xlane.xlu1 %3516 }
0x20d5   : > { %v3518_v20 = vmul.f32 0.03125, %v3517_v19 }
0x20d7   : > { %v3519_v21 = vadd.f32 1e-06, %v3518_v20 }
0x20d9   : > { %4413 = vrsqrt.f32 %v3519_v21 }
0x20e3   : > { %v4414_v22 = vpop.eup %4413 }
0x20e4   : > { %v3521_v23 = vmul.f32 %v4414_v22, %v3513_v11 }
0x20e6   : > { %v3522_v26 = vmul.f32 %v3521_v23, %v3506_v38 }
0x20e8   : > { %v3523_v27 = vadd.f32 %v3522_v26, %v3507_v24 }
0x20ea   : > { %4178 = vmatmul.mubr.msk.f32.vlgmr.msra.gmra.mrb[36].mxu1 %vm940_vm6, %v3523_v27 }
0x21bd   : > { %v3598_v29 = vpop.f32.mrb[36].mxu1 }
0x21be   : > { %v3599_v30 = vadd.f32 %v3598_v29, %v3528_v28  ;;  %v4179_v36 = vpop.f32.mrb[37].mxu1 }
0x21c0   : > { %3602 = vst [vmem:[%s594_s25] sm:$0x1] %v3599_v30 }
0x21c1   : > { %4428 = shalt.err (!%p4425_p3)
}
0x21c2   : > { %s4429_s20 = scalar_lea.hbm %s5331_s2, 16  ;;  %s4433_s0 = scalar_lea.hbm %s5436_s22, 32 }
0x21c3   : > { %p4430_p4 = scmp.ne.s32.totalorder %s5331_s2, %s4429_s20  ;;  %p4434_p9 = scmp.lt.u32.totalorder %s5331_s2, %s5436_s22 }
0x21c4   : > { %p4435_p10 = scmp.lt.u32.totalorder %s4433_s0, %s4429_s20  ;;  %p4437_p12 = scmp.lt.u32.totalorder %s4429_s20, %s5331_s2 }
0x21c5   : > { %p4431_p7 = pnand %p4430_p4, %p4633_p5 }
0x21c6   : > { %p4436_p11 = por %p4435_p10, %p4434_p9 }
0x21c7   : > { %p4432_p8 = pneg %p4431_p7 }
0x21c8   : > { %p4438_p13 = por %p4437_p12, %p4436_p11 }
0x21ca   : > { %p4439_p0 = pnand %p4438_p13, %p4432_p8 }
0x21cc   : > { %4442 = shalt.err (!%p4439_p0)
}
0x21cd   : > { %4315 = dma.vmem_to_hbm [thread:$0]  (%p4633_p5), %s5333_s18, 16, %s5331_s2, %s3604_s27  }
0x21ce PF: > { %s5437_s19 = sld [smem:[#allocation7_spill]]  ;;  %s5438_s24 = sld [smem:[#allocation5_spill]] }
0x21d4   : > { %p4321_p1 = scmp.ge.s32.totalorder %s5437_s19, 2  ;;  %s3628_s21 = sand.u32 1, %s5438_s24  }
0x21d5   : > { %s3629_s25 = scalar_lea.sflag [#allocation3], %s3628_s21 }
0x21d6   : > { %p4318_p2 = pnand %p4321_p1, %p4637_p6 }
0x21d8   : > { %4460 = dma.done.wait (!%p4318_p2), %s3629_s25, 16  }
0x21d9   : > { %4462 = vsyncadd (!%p4318_p2), %s3629_s25, 4294967280  ;;  %s5440_s21 = sld [smem:[#allocation8_spill]]  ;;  %s5441_s20 = sld [smem:[#allocation6_spill]] }
0x21da   : > { %s5442_s23 = sld [smem:[#allocation9_spill]]  ;;  %s5443_s0 = smov %s4469_s30 }
0x21df   : > { %p29_p3 = scmp.ge.s32.totalorder %s5440_s21, 4   ;;  %s5444_s30 = smov %s5441_s20 }
0x21e0   : > { %s5445_s20 = smov %s5442_s23 }
0x21e1   :  { %31 = sbr.rel (!%p29_p3) target bundleno = 10 (0xa), region = 143 }
0x21e8   :  { %3633 = vsyncpa [#allocation3], 1 }
0x21e9   :  { %3635 = vsyncpa [#allocation3 + $0x1], 1 }

</bundles_post_ra>
